<compile_context>
chip_gen: v5e
topology: v5e:2x2
jax: 0.10.0
libtpu: 0.0.40
codegen_flags: <defaults>
</compile_context>

<pallas_src>
import math

import jax
import jax.numpy as jnp
from jax.experimental import pallas as pl
from jax.experimental.pallas import tpu as pltpu


def feed_forward_kernel(x_ref, w1_ref, b1_ref, w2_ref, b2_ref, out_ref):
    """out = relu(x @ w1 + b1) @ w2 + b2, whole (B*S, E) batch in one shot."""
    x = x_ref[...]                                                       # (M, E_in) f32
    h = jnp.dot(x, w1_ref[...], preferred_element_type=jnp.float32) + b1_ref[...]
    h = jnp.maximum(h, 0.0)                                              # ReLU (VPU)
    out = jnp.dot(h, w2_ref[...], preferred_element_type=jnp.float32) + b2_ref[...]
    out_ref[...] = out.astype(out_ref.dtype)                             # single full-batch store


@jax.jit
def feed_forward(x, w1, b1, w2, b2):
    """FeedForward forward pass. x: (B, S, E_in); weights stored as (in, out)."""
    b_, s_, e_in = x.shape
    e_out = w2.shape[1]
    m = b_ * s_
    x2 = x.reshape(m, e_in)          # fold batch into rows: (B*S, E_in)

    vmem = pl.BlockSpec(memory_space=pltpu.MemorySpace.VMEM)
    out = pl.pallas_call(
        feed_forward_kernel,
        out_shape=jax.ShapeDtypeStruct((m, e_out), x.dtype),
        in_specs=[vmem, vmem, vmem, vmem, vmem],   # whole arrays resident in VMEM, one DMA each
        out_specs=vmem,
        # No grid: single invocation, everything (weights + activations ~0.8 MiB) fits in VMEM.
    )(x2, w1, b1, w2, b2)
    return out.reshape(b_, s_, e_out)


if __name__ == "__main__":
    # Small shapes consistent with how Transformer.py uses FeedForward:
    # FeedForward(inputEmbeddingSize, outputDim=inputEmbeddingSize) with the
    # module's hard default innerDim=2048.
    B, S = 2, 16
    E_IN, F, E_OUT = 32, 2048, 32

    key = jax.random.PRNGKey(0)
    kx, kw1, kb1, kw2, kb2 = jax.random.split(key, 5)

    x = jax.random.normal(kx, (B, S, E_IN), jnp.float32)

    # torch nn.Linear default init: U(-1/sqrt(fan_in), 1/sqrt(fan_in)); weights are
    # stored pre-transposed to (in, out) so the kernel computes x @ W + b.
    lim1 = 1.0 / math.sqrt(E_IN)
    w1 = jax.random.uniform(kw1, (E_IN, F), jnp.float32, -lim1, lim1)
    b1 = jax.random.uniform(kb1, (1, F), jnp.float32, -lim1, lim1)
    lim2 = 1.0 / math.sqrt(F)
    w2 = jax.random.uniform(kw2, (F, E_OUT), jnp.float32, -lim2, lim2)
    b2 = jax.random.uniform(kb2, (1, E_OUT), jnp.float32, -lim2, lim2)

    out = jax.block_until_ready(feed_forward(x, w1, b1, w2, b2))

    # Pure-JAX reference mirroring the PyTorch forward (f32).
    ref = jnp.maximum(x @ w1 + b1, 0.0) @ w2 + b2
    ref = jax.block_until_ready(ref)

    assert out.shape == (B, S, E_OUT) and out.dtype == jnp.float32
    if not jnp.allclose(out, ref, atol=2e-3, rtol=2e-3):
        raise AssertionError("Pallas FeedForward kernel disagrees with JAX reference")

    print("KERNEL_OK")
</pallas_src>

<mosaic_0001>
module attributes {stable_mosaic.version = 11 : i64} {
  func.func @feed_forward_kernel(%arg0: memref<32x32xf32, #tpu.memory_space<vmem>>, %arg1: memref<32x2048xf32, #tpu.memory_space<vmem>>, %arg2: memref<1x2048xf32, #tpu.memory_space<vmem>>, %arg3: memref<2048x32xf32, #tpu.memory_space<vmem>>, %arg4: memref<1x32xf32, #tpu.memory_space<vmem>>, %arg5: memref<32x32xf32, #tpu.memory_space<vmem>>) attributes {dimension_semantics = [], scalar_prefetch = 0 : i64, scratch_operands = 0 : i64, tpu.core_type = #tpu.core_type<tc>} {
    %c0 = arith.constant 0 : index
    %c0_0 = arith.constant 0 : index
    %0 = vector.load %arg0[%c0, %c0_0] : memref<32x32xf32, #tpu.memory_space<vmem>>, vector<32x32xf32>
    %c0_1 = arith.constant 0 : index
    %c0_2 = arith.constant 0 : index
    %1 = vector.load %arg1[%c0_1, %c0_2] : memref<32x2048xf32, #tpu.memory_space<vmem>>, vector<32x2048xf32>
    %cst = arith.constant dense<0.000000e+00> : vector<32x2048xf32>
    %2 = tpu.matmul %0, %1, %cst {dimension_numbers = #tpu.dot_dimension_numbers<[1], [0], [0], [1], [0, 0, 1, 1], [], []>} : vector<32x32xf32>, vector<32x2048xf32>, vector<32x2048xf32> -> vector<32x2048xf32>
    %c0_3 = arith.constant 0 : index
    %c0_4 = arith.constant 0 : index
    %3 = vector.load %arg2[%c0_3, %c0_4] : memref<1x2048xf32, #tpu.memory_space<vmem>>, vector<1x2048xf32>
    %4 = vector.broadcast %3 : vector<1x2048xf32> to vector<32x2048xf32>
    %5 = arith.addf %2, %4 : vector<32x2048xf32>
    %cst_5 = arith.constant 0.000000e+00 : f32
    %6 = vector.broadcast %cst_5 : f32 to vector<32x2048xf32>
    %7 = arith.maximumf %5, %6 : vector<32x2048xf32>
    %c0_6 = arith.constant 0 : index
    %c0_7 = arith.constant 0 : index
    %8 = vector.load %arg3[%c0_6, %c0_7] : memref<2048x32xf32, #tpu.memory_space<vmem>>, vector<2048x32xf32>
    %cst_8 = arith.constant dense<0.000000e+00> : vector<32x32xf32>
    %9 = tpu.matmul %7, %8, %cst_8 {dimension_numbers = #tpu.dot_dimension_numbers<[1], [0], [0], [1], [0, 0, 1, 1], [], []>} : vector<32x2048xf32>, vector<2048x32xf32>, vector<32x32xf32> -> vector<32x32xf32>
    %c0_9 = arith.constant 0 : index
    %c0_10 = arith.constant 0 : index
    %10 = vector.load %arg4[%c0_9, %c0_10] : memref<1x32xf32, #tpu.memory_space<vmem>>, vector<1x32xf32>
    %11 = vector.broadcast %10 : vector<1x32xf32> to vector<32x32xf32>
    %12 = arith.addf %9, %11 : vector<32x32xf32>
    %c0_11 = arith.constant 0 : index
    %c0_12 = arith.constant 0 : index
    %13 = vector.load %arg5[%c0_11, %c0_12] : memref<32x32xf32, #tpu.memory_space<vmem>>, vector<32x32xf32>
    tpu.vector_store %arg5[%c0_11, %c0_12], %12 {strides = array<i32>} : memref<32x32xf32, #tpu.memory_space<vmem>>, vector<32x32xf32>,
    return
  }
}

</mosaic_0001>

<bundles_post_ra>
// kernel: feed_forward.1
= control target key start
LH: loop header
LB: loop body
LE: loop exit
PB: predicated region body
PF: predicated region fallthrough
CT: control target
= control target key end

     0   :  { %vm125_vm0 = vcmask 261120   ;;  %s2779_s0 = inlined_call_operand.vmem [shape: f32[32,32], index: 0, kind: input, shape index: {}]   ;;  %s2780_s1 = inlined_call_operand.vmem [shape: f32[32,2048], index: 1, kind: input, shape index: {}]   ;;  %s2781_s2 = inlined_call_operand.vmem [shape: f32[1,2048], index: 2, kind: input, shape index: {}]   ;;  %s2782_s3 = inlined_call_operand.vmem [shape: f32[2048,32], index: 3, kind: input, shape index: {}]   ;;  %s2783_s4 = inlined_call_operand.vmem [shape: f32[1,32], index: 4, kind: input, shape index: {}]   ;;  %s2784_s5 = inlined_call_operand.hbm [shape: f32[32,32], index: 5, kind: output, shape index: {}]  }
   0x1   :  { %v73_v0 = vld [vmem:[%s2780_s1 + $0x180] sm:$0xff]  ;;  %v75_v1 = vld [vmem:[%s2780_s1 + $0x190] sm:$0xff]  ;;  %v74_v3 = vld [vmem:[%s2780_s1 + $0x188] sm:$0xff] }
   0x2   :  { %v57_v2 = vld [vmem:[%s2780_s1 + $0x100] sm:$0xff]  ;;  %150 = vmatpush.msra.mxu0 %v73_v0  ;;  %208 = vmatpush.msra.mxu2 %v75_v1  ;;  %v59_v4 = vld [vmem:[%s2780_s1 + $0x110] sm:$0xff]  ;;  %v76_v5 = vld [vmem:[%s2780_s1 + $0x198] sm:$0xff] }
   0x3   :  { %179 = vmatpush.msra.mxu1 %v74_v3  ;;  %237 = vmatpush.msra.mxu3 %v76_v5  ;;  %v41_v6 = vld [vmem:[%s2780_s1 + $0x80] sm:$0xff]  ;;  %v58_v7 = vld [vmem:[%s2780_s1 + $0x108] sm:$0xff]  ;;  %v43_v8 = vld [vmem:[%s2780_s1 + $0x90] sm:$0xff] }
   0x4   :  { %151 = vmatpush.msra.mxu0 %v57_v2  ;;  %209 = vmatpush.msra.mxu2 %v59_v4  ;;  %v60_v9 = vld [vmem:[%s2780_s1 + $0x118] sm:$0xff]  ;;  %v42_v10 = vld [vmem:[%s2780_s1 + $0x88] sm:$0xff]  ;;  %v25_v11 = vld [vmem:[%s2780_s1] sm:$0xff] }
   0x5   :  { %180 = vmatpush.msra.mxu1 %v58_v7  ;;  %238 = vmatpush.msra.mxu3 %v60_v9  ;;  %v27_v12 = vld [vmem:[%s2780_s1 + $0x10] sm:$0xff]  ;;  %v44_v13 = vld [vmem:[%s2780_s1 + $0x98] sm:$0xff]  ;;  %v1584_v14 = vld [vmem:[%s2779_s0] sm:$0xff] }
   0x6   :  { %152 = vmatpush.msra.mxu0 %v41_v6  ;;  %210 = vmatpush.msra.mxu2 %v43_v8  ;;  %v79_v15 = vld [vmem:[%s2780_s1 + $0x1b0] sm:$0xff]  ;;  %v26_v16 = vld [vmem:[%s2780_s1 + $0x8] sm:$0xff]  ;;  %v28_v17 = vld [vmem:[%s2780_s1 + $0x18] sm:$0xff] }
   0x7   :  { %181 = vmatpush.msra.mxu1 %v42_v10  ;;  %239 = vmatpush.msra.mxu3 %v44_v13  ;;  %v77_v18 = vld [vmem:[%s2780_s1 + $0x1a0] sm:$0xff]  ;;  %v80_v19 = vld [vmem:[%s2780_s1 + $0x1b8] sm:$0xff]  ;;  %v63_v20 = vld [vmem:[%s2780_s1 + $0x130] sm:$0xff] }
   0x8   :  { %153 = vmatpush.msra.mxu0 %v25_v11  ;;  %211 = vmatpush.msra.mxu2 %v27_v12  ;;  %v78_v21 = vld [vmem:[%s2780_s1 + $0x1a8] sm:$0xff]  ;;  %v61_v22 = vld [vmem:[%s2780_s1 + $0x120] sm:$0xff]  ;;  %v64_v23 = vld [vmem:[%s2780_s1 + $0x138] sm:$0xff] }
   0x9   :  { %1412 = vmatmul.msk.f32.vlgmr.msra.gmra.mxu0 %vm125_vm0, %v1584_v14  ;;  %1420 = vmatmul.msk.f32.vlgmr.msra.gmra.mxu2 %vm125_vm0, %v1584_v14  ;;  %v47_v24 = vld [vmem:[%s2780_s1 + $0xb0] sm:$0xff]  ;;  %v62_v25 = vld [vmem:[%s2780_s1 + $0x128] sm:$0xff]  ;;  %v45_v26 = vld [vmem:[%s2780_s1 + $0xa0] sm:$0xff] }
   0xa   :  { %324 = vmatpush.msrb.mxu2 %v79_v15  ;;  %182 = vmatpush.msra.mxu1 %v26_v16  ;;  %v1633_v27 = vld [vmem:[%s2779_s0 + $0x8] sm:$0xff] }
   0xb   :  { %240 = vmatpush.msra.mxu3 %v28_v17  ;;  %1416 = vmatmul.msk.f32.vlgmr.msra.gmra.mxu1 %vm125_vm0, %v1584_v14 }
   0xc   :  { %1424 = vmatmul.msk.f32.vlgmr.msra.gmra.mxu3 %vm125_vm0, %v1584_v14  ;;  %266 = vmatpush.msrb.mxu0 %v77_v18 }
   0xd   :  { %353 = vmatpush.msrb.mxu3 %v80_v19  ;;  %325 = vmatpush.msrb.mxu2 %v63_v20 }
   0xe   :  { %295 = vmatpush.msrb.mxu1 %v78_v21  ;;  %267 = vmatpush.msrb.mxu0 %v61_v22 }
   0xf   :  { %10 = vsyncpa [#allocation3], 0  ;;  %354 = vmatpush.msrb.mxu3 %v64_v23  ;;  %326 = vmatpush.msrb.mxu2 %v47_v24  ;;  %v48_v28 = vld [vmem:[%s2780_s1 + $0xb8] sm:$0xff]  ;;  %v31_v29 = vld [vmem:[%s2780_s1 + $0x30] sm:$0xff]  ;;  %s1400_s28 = sshll.u32 %s2784_s5, 4  ;;  %s1507_s29 = smov 128   ;;  %s1401_s28 = int_to_ptr.hbm [resolvable:$true] %s1400_s28 }
  0x10   :  { %296 = vmatpush.msrb.mxu1 %v62_v25  ;;  %268 = vmatpush.msrb.mxu0 %v45_v26  ;;  %v29_v30 = vld [vmem:[%s2780_s1 + $0x20] sm:$0xff]  ;;  %v46_v31 = vld [vmem:[%s2780_s1 + $0xa8] sm:$0xff]  ;;  %v32_v32 = vld [vmem:[%s2780_s1 + $0x38] sm:$0xff]  ;;  %s1508_s30 = smov 8  }
  0x11   :  { %1413 = vmatmul.msk.f32.gmra.mxu0 %vm125_vm0, %v1633_v27  ;;  %1421 = vmatmul.msk.f32.gmra.mxu2 %vm125_vm0, %v1633_v27  ;;  %v83_v33 = vld [vmem:[%s2780_s1 + $0x1d0] sm:$0xff]  ;;  %v30_v34 = vld [vmem:[%s2780_s1 + $0x28] sm:$0xff]  ;;  %v84_v35 = vld [vmem:[%s2780_s1 + $0x1d8] sm:$0xff] }
  0x12   :  { %355 = vmatpush.msrb.mxu3 %v48_v28  ;;  %327 = vmatpush.msrb.mxu2 %v31_v29  ;;  %v81_v36 = vld [vmem:[%s2780_s1 + $0x1c0] sm:$0xff]  ;;  %v67_v37 = vld [vmem:[%s2780_s1 + $0x150] sm:$0xff]  ;;  %v82_v38 = vld [vmem:[%s2780_s1 + $0x1c8] sm:$0xff] }
  0x13   :  { %1417 = vmatmul.msk.f32.gmra.mxu1 %vm125_vm0, %v1633_v27  ;;  %269 = vmatpush.msrb.mxu0 %v29_v30  ;;  %v68_v39 = vld [vmem:[%s2780_s1 + $0x158] sm:$0xff]  ;;  %v1682_v40 = vld [vmem:[%s2779_s0 + $0x10] sm:$0xff]  ;;  %v65_v41 = vld [vmem:[%s2780_s1 + $0x140] sm:$0xff] }
  0x14   :  { %1425 = vmatmul.msk.f32.gmra.mxu3 %vm125_vm0, %v1633_v27  ;;  %297 = vmatpush.msrb.mxu1 %v46_v31  ;;  %v51_v42 = vld [vmem:[%s2780_s1 + $0xd0] sm:$0xff]  ;;  %v66_v43 = vld [vmem:[%s2780_s1 + $0x148] sm:$0xff]  ;;  %v52_v44 = vld [vmem:[%s2780_s1 + $0xd8] sm:$0xff] }
  0x15   :  { %356 = vmatpush.msrb.mxu3 %v32_v32  ;;  %440 = vmatpush.msra.mxu2 %v83_v33  ;;  %v1707_v45 = vld [vmem:[%s2779_s0 + $0x18] sm:$0xff]  ;;  %v49_v46 = vld [vmem:[%s2780_s1 + $0xc0] sm:$0xff]  ;;  %v35_v47 = vld [vmem:[%s2780_s1 + $0x50] sm:$0xff] }
  0x16   :  { %298 = vmatpush.msrb.mxu1 %v30_v34  ;;  %382 = vmatpush.msra.mxu0 %v81_v36  ;;  %v50_v48 = vld [vmem:[%s2780_s1 + $0xc8] sm:$0xff]  ;;  %v36_v49 = vld [vmem:[%s2780_s1 + $0x58] sm:$0xff]  ;;  %v33_v50 = vld [vmem:[%s2780_s1 + $0x40] sm:$0xff] }
  0x17   :  { %469 = vmatpush.msra.mxu3 %v84_v35  ;;  %441 = vmatpush.msra.mxu2 %v67_v37  ;;  %v87_v51 = vld [vmem:[%s2780_s1 + $0x1f0] sm:$0xff]  ;;  %v34_v52 = vld [vmem:[%s2780_s1 + $0x48] sm:$0xff]  ;;  %v88_v53 = vld [vmem:[%s2780_s1 + $0x1f8] sm:$0xff] }
  0x18   :  { %411 = vmatpush.msra.mxu1 %v82_v38  ;;  %383 = vmatpush.msra.mxu0 %v65_v41  ;;  %v85_v54 = vld [vmem:[%s2780_s1 + $0x1e0] sm:$0xff]  ;;  %v71_v55 = vld [vmem:[%s2780_s1 + $0x170] sm:$0xff]  ;;  %v86_v56 = vld [vmem:[%s2780_s1 + $0x1e8] sm:$0xff] }
  0x19   :  { %470 = vmatpush.msra.mxu3 %v68_v39  ;;  %1414 = vmatmul.msk.f32.gmra.mxu0 %vm125_vm0, %v1682_v40  ;;  %v72_v57 = vld [vmem:[%s2780_s1 + $0x178] sm:$0xff]  ;;  %v69_v58 = vld [vmem:[%s2780_s1 + $0x160] sm:$0xff]  ;;  %v55_v59 = vld [vmem:[%s2780_s1 + $0xf0] sm:$0xff] }
  0x1a   :  { %1422 = vmatmul.msk.f32.gmra.mxu2 %vm125_vm0, %v1682_v40  ;;  %412 = vmatpush.msra.mxu1 %v66_v43  ;;  %v70_v60 = vld [vmem:[%s2780_s1 + $0x168] sm:$0xff]  ;;  %v56_v61 = vld [vmem:[%s2780_s1 + $0xf8] sm:$0xff]  ;;  %v53_v62 = vld [vmem:[%s2780_s1 + $0xe0] sm:$0xff] }
  0x1b   :  { %442 = vmatpush.msra.mxu2 %v51_v42  ;;  %1418 = vmatmul.msk.f32.gmra.mxu1 %vm125_vm0, %v1682_v40  ;;  %v39_v63 = vld [vmem:[%s2780_s1 + $0x70] sm:$0xff]  ;;  %v54_v0 = vld [vmem:[%s2780_s1 + $0xe8] sm:$0xff]  ;;  %v40_v1 = vld [vmem:[%s2780_s1 + $0x78] sm:$0xff] }
  0x1c   :  { %1426 = vmatmul.msk.f32.gmra.mxu3 %vm125_vm0, %v1682_v40  ;;  %384 = vmatpush.msra.mxu0 %v49_v46  ;;  %v37_v2 = vld [vmem:[%s2780_s1 + $0x60] sm:$0xff]  ;;  %v38_v3 = vld [vmem:[%s2780_s1 + $0x68] sm:$0xff]  ;;  %v681_v4 = vld [vmem:[%s2782_s3 + $0x78] sm:$0xff] }
  0x1d   :  { %471 = vmatpush.msra.mxu3 %v52_v44  ;;  %443 = vmatpush.msra.mxu2 %v35_v47  ;;  %v680_v5 = vld [vmem:[%s2782_s3 + $0x70] sm:$0xff]  ;;  %v697_v6 = vld [vmem:[%s2782_s3 + $0xf8] sm:$0xff]  ;;  %v679_v8 = vld [vmem:[%s2782_s3 + $0x68] sm:$0xff] }
  0x1e   :  { %413 = vmatpush.msra.mxu1 %v50_v48  ;;  %385 = vmatpush.msra.mxu0 %v33_v50  ;;  %v696_v7 = vld [vmem:[%s2782_s3 + $0xf0] sm:$0xff]  ;;  %v713_v9 = vld [vmem:[%s2782_s3 + $0x178] sm:$0xff]  ;;  %v678_v10 = vld [vmem:[%s2782_s3 + $0x60] sm:$0xff] }
  0x1f   :  { %472 = vmatpush.msra.mxu3 %v36_v49  ;;  %v695_v11 = vld [vmem:[%s2782_s3 + $0xe8] sm:$0xff]  ;;  %v712_v12 = vld [vmem:[%s2782_s3 + $0x170] sm:$0xff]  ;;  %v729_v13 = vld [vmem:[%s2782_s3 + $0x1f8] sm:$0xff] }
  0x20   :  { %414 = vmatpush.msra.mxu1 %v34_v52  ;;  %v677_v15 = vld [vmem:[%s2782_s3 + $0x58] sm:$0xff]  ;;  %v694_v16 = vld [vmem:[%s2782_s3 + $0xe0] sm:$0xff]  ;;  %v711_v17 = vld [vmem:[%s2782_s3 + $0x168] sm:$0xff] }
  0x21   :  { %1415 = vmatmul.msk.f32.gmra.mxu0 %vm125_vm0, %v1707_v45  ;;  %v728_v18 = vld [vmem:[%s2782_s3 + $0x1f0] sm:$0xff]  ;;  %v693_v20 = vld [vmem:[%s2782_s3 + $0xd8] sm:$0xff]  ;;  %v710_v21 = vld [vmem:[%s2782_s3 + $0x160] sm:$0xff] }
  0x22   :  { %1423 = vmatmul.msk.f32.gmra.mxu2 %vm125_vm0, %v1707_v45  ;;  %v676_v19 = vld [vmem:[%s2782_s3 + $0x50] sm:$0xff]  ;;  %v727_v22 = vld [vmem:[%s2782_s3 + $0x1e8] sm:$0xff]  ;;  %v709_v25 = vld [vmem:[%s2782_s3 + $0x158] sm:$0xff] }
  0x23   :  { %1419 = vmatmul.msk.f32.gmra.mxu1 %vm125_vm0, %v1707_v45  ;;  %v675_v23 = vld [vmem:[%s2782_s3 + $0x48] sm:$0xff]  ;;  %v692_v24 = vld [vmem:[%s2782_s3 + $0xd0] sm:$0xff]  ;;  %v726_v26 = vld [vmem:[%s2782_s3 + $0x1e0] sm:$0xff] }
  0x24   :  { %1427 = vmatmul.msk.f32.gmra.mxu3 %vm125_vm0, %v1707_v45  ;;  %v674_v28 = vld [vmem:[%s2782_s3 + $0x40] sm:$0xff]  ;;  %v691_v29 = vld [vmem:[%s2782_s3 + $0xc8] sm:$0xff]  ;;  %v708_v30 = vld [vmem:[%s2782_s3 + $0x150] sm:$0xff] }
  0x25   :  { %v725_v31 = vld [vmem:[%s2782_s3 + $0x1d8] sm:$0xff]  ;;  %v690_v33 = vld [vmem:[%s2782_s3 + $0xc0] sm:$0xff]  ;;  %v707_v34 = vld [vmem:[%s2782_s3 + $0x148] sm:$0xff] }
  0x26   :  { %v673_v32 = vld [vmem:[%s2782_s3 + $0x38] sm:$0xff]  ;;  %v724_v35 = vld [vmem:[%s2782_s3 + $0x1d0] sm:$0xff]  ;;  %v706_v38 = vld [vmem:[%s2782_s3 + $0x140] sm:$0xff] }
  0x27   :  { %v672_v36 = vld [vmem:[%s2782_s3 + $0x30] sm:$0xff]  ;;  %v689_v37 = vld [vmem:[%s2782_s3 + $0xb8] sm:$0xff]  ;;  %v723_v39 = vld [vmem:[%s2782_s3 + $0x1c8] sm:$0xff] }
  0x28   :  { %v671_v41 = vld [vmem:[%s2782_s3 + $0x28] sm:$0xff]  ;;  %v688_v42 = vld [vmem:[%s2782_s3 + $0xb0] sm:$0xff]  ;;  %v705_v43 = vld [vmem:[%s2782_s3 + $0x138] sm:$0xff] }
  0x29   :  { %1428 = vmatmul.msk.f32.vlgmr.msrb.gmra.mxu0 %vm125_vm0, %v1584_v14  ;;  %v722_v44 = vld [vmem:[%s2782_s3 + $0x1c0] sm:$0xff]  ;;  %v687_v47 = vld [vmem:[%s2782_s3 + $0xa8] sm:$0xff]  ;;  %v704_v48 = vld [vmem:[%s2782_s3 + $0x130] sm:$0xff] }
  0x2a   :  { %1436 = vmatmul.msk.f32.vlgmr.msrb.gmra.mxu2 %vm125_vm0, %v1584_v14  ;;  %498 = vmatpush.msrb.mxu0 %v85_v54  ;;  %v670_v46 = vld [vmem:[%s2782_s3 + $0x20] sm:$0xff]  ;;  %v721_v49 = vld [vmem:[%s2782_s3 + $0x1b8] sm:$0xff]  ;;  %v703_v52 = vld [vmem:[%s2782_s3 + $0x128] sm:$0xff] }
  0x2b   :  { %556 = vmatpush.msrb.mxu2 %v87_v51  ;;  %1432 = vmatmul.msk.f32.vlgmr.msrb.gmra.mxu1 %vm125_vm0, %v1584_v14  ;;  %v669_v50 = vld [vmem:[%s2782_s3 + $0x18] sm:$0xff]  ;;  %v686_v51 = vld [vmem:[%s2782_s3 + $0xa0] sm:$0xff]  ;;  %v668_v54 = vld [vmem:[%s2782_s3 + $0x10] sm:$0xff] }
  0x2c   :  { %1440 = vmatmul.msk.f32.vlgmr.msrb.gmra.mxu3 %vm125_vm0, %v1584_v14  ;;  %527 = vmatpush.msrb.mxu1 %v86_v56  ;;  %v702_v56 = vld [vmem:[%s2782_s3 + $0x120] sm:$0xff] }
  0x2d   :  { %585 = vmatpush.msrb.mxu3 %v88_v53  ;;  %557 = vmatpush.msrb.mxu2 %v71_v55  ;;  %v720_v53 = vld [vmem:[%s2782_s3 + $0x1b0] sm:$0xff]  ;;  %v685_v55 = vld [vmem:[%s2782_s3 + $0x98] sm:$0xff] }
  0x2e   :  { %499 = vmatpush.msrb.mxu0 %v69_v58  ;;  %528 = vmatpush.msrb.mxu1 %v70_v60  ;;  %v667_v58 = vld [vmem:[%s2782_s3 + $0x8] sm:$0xff]  ;;  %v718_v60 = vld [vmem:[%s2782_s3 + $0x1a0] sm:$0xff] }
  0x2f   :  { %586 = vmatpush.msrb.mxu3 %v72_v57  ;;  %558 = vmatpush.msrb.mxu2 %v55_v59  ;;  %v719_v57 = vld [vmem:[%s2782_s3 + $0x1a8] sm:$0xff]  ;;  %v701_v59 = vld [vmem:[%s2782_s3 + $0x118] sm:$0xff] }
  0x30   :  { %500 = vmatpush.msrb.mxu0 %v53_v62  ;;  %529 = vmatpush.msrb.mxu1 %v54_v0  ;;  %v683_v62 = vld [vmem:[%s2782_s3 + $0x88] sm:$0xff]  ;;  %v717_v0 = vld [vmem:[%s2782_s3 + $0x198] sm:$0xff] }
  0x31   :  { %1429 = vmatmul.msk.f32.gmra.mxu0 %vm125_vm0, %v1633_v27  ;;  %587 = vmatpush.msrb.mxu3 %v56_v61  ;;  %v666_v61 = vld [vmem:[%s2782_s3] sm:$0xff] }
  0x32   :  { %1437 = vmatmul.msk.f32.gmra.mxu2 %vm125_vm0, %v1633_v27  ;;  %501 = vmatpush.msrb.mxu0 %v37_v2  ;;  %v682_v2 = vld [vmem:[%s2782_s3 + $0x80] sm:$0xff] }
  0x33   :  { %1433 = vmatmul.msk.f32.gmra.mxu1 %vm125_vm0, %v1633_v27  ;;  %559 = vmatpush.msrb.mxu2 %v39_v63  ;;  %v700_v63 = vld [vmem:[%s2782_s3 + $0x110] sm:$0xff] }
  0x34   :  { %1441 = vmatmul.msk.f32.gmra.mxu3 %vm125_vm0, %v1633_v27  ;;  %530 = vmatpush.msrb.mxu1 %v38_v3  ;;  %v699_v3 = vld [vmem:[%s2782_s3 + $0x108] sm:$0xff] }
  0x35   :  { %588 = vmatpush.msrb.mxu3 %v40_v1  ;;  %v745_v1 = vld [vmem:[%s2782_s3 + $0x278] sm:$0xff] }
  0x39   :  { %1430 = vmatmul.msk.f32.gmra.mxu0 %vm125_vm0, %v1682_v40 }
  0x3a   :  { %1438 = vmatmul.msk.f32.gmra.mxu2 %vm125_vm0, %v1682_v40 }
  0x3b   :  { %1434 = vmatmul.msk.f32.gmra.mxu1 %vm125_vm0, %v1682_v40 }
  0x3c   :  { %1442 = vmatmul.msk.f32.gmra.mxu3 %vm125_vm0, %v1682_v40 }
  0x41   :  { %1431 = vmatmul.msk.f32.gmra.mxu0 %vm125_vm0, %v1707_v45 }
  0x42   :  { %1439 = vmatmul.msk.f32.gmra.mxu2 %vm125_vm0, %v1707_v45 }
  0x43   :  { %1435 = vmatmul.msk.f32.gmra.mxu1 %vm125_vm0, %v1707_v45 }
  0x44   :  { %1443 = vmatmul.msk.f32.gmra.mxu3 %vm125_vm0, %v1707_v45 }
  0x49   :  { %1444 = vmatmul.msk.f32.vlgmr.msra.gmra.mxu0 %vm125_vm0, %v1584_v14 }
  0x4a   :  { %1452 = vmatmul.msk.f32.vlgmr.msra.gmra.mxu2 %vm125_vm0, %v1584_v14  ;;  %926 = vmatpush.msra.mxu0 %v681_v4  ;;  %v716_v4 = vld [vmem:[%s2782_s3 + $0x190] sm:$0xff] }
  0x4b   :  { %1448 = vmatmul.msk.f32.vlgmr.msra.gmra.mxu1 %vm125_vm0, %v1584_v14  ;;  %984 = vmatpush.msra.mxu2 %v713_v9  ;;  %v760_v9 = vld [vmem:[%s2782_s3 + $0x2f0] sm:$0xff] }
  0x4c   :  { %1456 = vmatmul.msk.f32.vlgmr.msra.gmra.mxu3 %vm125_vm0, %v1584_v14  ;;  %955 = vmatpush.msra.mxu1 %v697_v6  ;;  %v698_v6 = vld [vmem:[%s2782_s3 + $0x100] sm:$0xff] }
  0x4d   :  { %927 = vmatpush.msra.mxu0 %v680_v5  ;;  %985 = vmatpush.msra.mxu2 %v712_v12  ;;  %v744_v5 = vld [vmem:[%s2782_s3 + $0x270] sm:$0xff]  ;;  %v742_v12 = vld [vmem:[%s2782_s3 + $0x260] sm:$0xff] }
  0x4e   :  { %956 = vmatpush.msra.mxu1 %v696_v7  ;;  %1013 = vmatpush.msra.mxu3 %v729_v13  ;;  %v715_v7 = vld [vmem:[%s2782_s3 + $0x188] sm:$0xff] }
  0x4f   :  { %928 = vmatpush.msra.mxu0 %v679_v8  ;;  %986 = vmatpush.msra.mxu2 %v711_v17  ;;  %v743_v8 = vld [vmem:[%s2782_s3 + $0x268] sm:$0xff]  ;;  %v741_v17 = vld [vmem:[%s2782_s3 + $0x258] sm:$0xff] }
  0x50   :  { %957 = vmatpush.msra.mxu1 %v695_v11  ;;  %1014 = vmatpush.msra.mxu3 %v728_v18  ;;  %v777_v11 = vld [vmem:[%s2782_s3 + $0x378] sm:$0xff]  ;;  %v759_v13 = vld [vmem:[%s2782_s3 + $0x2e8] sm:$0xff] }
  0x51   :  { %1445 = vmatmul.msk.f32.gmra.mxu0 %vm125_vm0, %v1633_v27  ;;  %987 = vmatpush.msra.mxu2 %v710_v21  ;;  %v775_v18 = vld [vmem:[%s2782_s3 + $0x368] sm:$0xff]  ;;  %v740_v21 = vld [vmem:[%s2782_s3 + $0x250] sm:$0xff] }
  0x52   :  { %1453 = vmatmul.msk.f32.gmra.mxu2 %vm125_vm0, %v1633_v27  ;;  %929 = vmatpush.msra.mxu0 %v678_v10  ;;  %v714_v10 = vld [vmem:[%s2782_s3 + $0x180] sm:$0xff] }
  0x53   :  { %1449 = vmatmul.msk.f32.gmra.mxu1 %vm125_vm0, %v1633_v27  ;;  %1015 = vmatpush.msra.mxu3 %v727_v22  ;;  %v757_v22 = vld [vmem:[%s2782_s3 + $0x2d8] sm:$0xff] }
  0x54   :  { %1457 = vmatmul.msk.f32.gmra.mxu3 %vm125_vm0, %v1633_v27  ;;  %930 = vmatpush.msra.mxu0 %v677_v15  ;;  %v793_v15 = vld [vmem:[%s2782_s3 + $0x3f8] sm:$0xff] }
  0x55   :  { %958 = vmatpush.msra.mxu1 %v694_v16  ;;  %988 = vmatpush.msra.mxu2 %v709_v25  ;;  %v776_v16 = vld [vmem:[%s2782_s3 + $0x370] sm:$0xff]  ;;  %v791_v25 = vld [vmem:[%s2782_s3 + $0x3e8] sm:$0xff] }
  0x56   :  { %931 = vmatpush.msra.mxu0 %v676_v19  ;;  %1016 = vmatpush.msra.mxu3 %v726_v26  ;;  %v2105_v19 = vld [vmem:[%s2781_s2] sm:$0xff]  ;;  %v739_v26 = vld [vmem:[%s2782_s3 + $0x248] sm:$0xff] }
  0x57   :  { %959 = vmatpush.msra.mxu1 %v693_v20  ;;  %989 = vmatpush.msra.mxu2 %v708_v30  ;;  %v792_v20 = vld [vmem:[%s2782_s3 + $0x3f0] sm:$0xff]  ;;  %v2143_v30 = vperm.slane %v2105_v19, 1 }
  0x58   :  { %932 = vmatpush.msra.mxu0 %v675_v23  ;;  %1017 = vmatpush.msra.mxu3 %v725_v31  ;;  %v774_v23 = vld [vmem:[%s2782_s3 + $0x360] sm:$0xff] }
  0x59   :  { %1446 = vmatmul.msk.f32.gmra.mxu0 %vm125_vm0, %v1682_v40  ;;  %960 = vmatpush.msra.mxu1 %v692_v24  ;;  %v2126_v24 = vperm.slane %v2105_v19, 0  ;;  %v790_v31 = vld [vmem:[%s2782_s3 + $0x3e0] sm:$0xff] }
  0x5a   :  { %1454 = vmatmul.msk.f32.gmra.mxu2 %vm125_vm0, %v1682_v40  ;;  %933 = vmatpush.msra.mxu0 %v674_v28  ;;  %v756_v28 = vld [vmem:[%s2782_s3 + $0x2d0] sm:$0xff] }
  0x5b   :  { %1450 = vmatmul.msk.f32.gmra.mxu1 %vm125_vm0, %v1682_v40  ;;  %990 = vmatpush.msra.mxu2 %v707_v34  ;;  %v772_v34 = vld [vmem:[%s2782_s3 + $0x350] sm:$0xff] }
  0x5c   :  { %1458 = vmatmul.msk.f32.gmra.mxu3 %vm125_vm0, %v1682_v40  ;;  %961 = vmatpush.msra.mxu1 %v691_v29  ;;  %v773_v29 = vld [vmem:[%s2782_s3 + $0x358] sm:$0xff] }
  0x5d   :  { %934 = vmatpush.msra.mxu0 %v673_v32  ;;  %1018 = vmatpush.msra.mxu3 %v724_v35 }
  0x5e   :  { %962 = vmatpush.msra.mxu1 %v690_v33  ;;  %991 = vmatpush.msra.mxu2 %v706_v38  ;;  %v755_v33 = vld [vmem:[%s2782_s3 + $0x2c8] sm:$0xff] }
  0x5f   :  { %935 = vmatpush.msra.mxu0 %v672_v36  ;;  %1019 = vmatpush.msra.mxu3 %v723_v39  ;;  %v789_v36 = vld [vmem:[%s2782_s3 + $0x3d8] sm:$0xff]  ;;  %v754_v39 = vld [vmem:[%s2782_s3 + $0x2c0] sm:$0xff] }
  0x60   :  { %963 = vmatpush.msra.mxu1 %v689_v37  ;;  %992 = vmatpush.msra.mxu2 %v705_v43  ;;  %v737_v37 = vld [vmem:[%s2782_s3 + $0x238] sm:$0xff]  ;;  %v2169_v43 = vperm.slane %v2105_v19, 2 }
  0x61   :  { %1447 = vmatmul.msk.f32.gmra.mxu0 %vm125_vm0, %v1707_v45  ;;  %1020 = vmatpush.msra.mxu3 %v722_v44  ;;  %v771_v44 = vld [vmem:[%s2782_s3 + $0x348] sm:$0xff] }
  0x62   :  { %1455 = vmatmul.msk.f32.gmra.mxu2 %vm125_vm0, %v1707_v45  ;;  %936 = vmatpush.msra.mxu0 %v671_v41 }
  0x63   :  { %1451 = vmatmul.msk.f32.gmra.mxu1 %vm125_vm0, %v1707_v45  ;;  %993 = vmatpush.msra.mxu2 %v704_v48 }
  0x64   :  { %1459 = vmatmul.msk.f32.gmra.mxu3 %vm125_vm0, %v1707_v45  ;;  %964 = vmatpush.msra.mxu1 %v688_v42 }
  0x65   :  { %937 = vmatpush.msra.mxu0 %v670_v46  ;;  %1021 = vmatpush.msra.mxu3 %v721_v49  ;;  %v788_v46 = vld [vmem:[%s2782_s3 + $0x3d0] sm:$0xff]  ;;  %v753_v49 = vld [vmem:[%s2782_s3 + $0x2b8] sm:$0xff] }
  0x66   :  { %965 = vmatpush.msra.mxu1 %v687_v47  ;;  %994 = vmatpush.msra.mxu2 %v703_v52  ;;  %v736_v47 = vld [vmem:[%s2782_s3 + $0x230] sm:$0xff]  ;;  %v2187_v52 = vperm.slane %v2105_v19, 3 }
  0x67   :  { %938 = vmatpush.msra.mxu0 %v669_v50  ;;  %1022 = vmatpush.msra.mxu3 %v720_v53  ;;  %v770_v50 = vld [vmem:[%s2782_s3 + $0x340] sm:$0xff]  ;;  %v787_v53 = vld [vmem:[%s2782_s3 + $0x3c8] sm:$0xff] }
  0x68   :  { %966 = vmatpush.msra.mxu1 %v686_v51  ;;  %995 = vmatpush.msra.mxu2 %v702_v56  ;;  %v752_v56 = vld [vmem:[%s2782_s3 + $0x2b0] sm:$0xff] }
  0x69   :  { %1460 = vmatmul.msk.f32.vlgmr.msrb.gmra.mxu0 %vm125_vm0, %v1584_v14  ;;  %1023 = vmatpush.msra.mxu3 %v719_v57  ;;  %v769_v57 = vld [vmem:[%s2782_s3 + $0x338] sm:$0xff] }
  0x6a   :  { %1468 = vmatmul.msk.f32.vlgmr.msrb.gmra.mxu2 %vm125_vm0, %v1584_v14  ;;  %939 = vmatpush.msra.mxu0 %v668_v54  ;;  %v735_v54 = vld [vmem:[%s2782_s3 + $0x228] sm:$0xff] }
  0x6b   :  { %1464 = vmatmul.msk.f32.vlgmr.msrb.gmra.mxu1 %vm125_vm0, %v1584_v14  ;;  %996 = vmatpush.msra.mxu2 %v701_v59 }
  0x6c   :  { %1472 = vmatmul.msk.f32.vlgmr.msrb.gmra.mxu3 %vm125_vm0, %v1584_v14  ;;  %967 = vmatpush.msra.mxu1 %v685_v55  ;;  %v684_v14 = vld [vmem:[%s2782_s3 + $0x90] sm:$0xff] }
  0x6d   :  { %940 = vmatpush.msra.mxu0 %v667_v58  ;;  %1024 = vmatpush.msra.mxu3 %v718_v60 }
  0x6e   :  { %968 = vmatpush.msra.mxu1 %v684_v14  ;;  %997 = vmatpush.msra.mxu2 %v700_v63  ;;  %v786_v14 = vld [vmem:[%s2782_s3 + $0x3c0] sm:$0xff]  ;;  %v751_v63 = vld [vmem:[%s2782_s3 + $0x2a8] sm:$0xff] }
  0x6f   :  { %941 = vmatpush.msra.mxu0 %v666_v61  ;;  %1025 = vmatpush.msra.mxu3 %v717_v0 }
  0x70   :  { %969 = vmatpush.msra.mxu1 %v683_v62  ;;  %998 = vmatpush.msra.mxu2 %v699_v3  ;;  %v734_v62 = vld [vmem:[%s2782_s3 + $0x220] sm:$0xff] }
  0x71   :  { %1461 = vmatmul.msk.f32.gmra.mxu0 %vm125_vm0, %v1633_v27  ;;  %1026 = vmatpush.msra.mxu3 %v716_v4 }
  0x72   :  { %1469 = vmatmul.msk.f32.gmra.mxu2 %vm125_vm0, %v1633_v27  ;;  %1042 = vmatpush.msrb.mxu0 %v745_v1 }
  0x73   :  { %1465 = vmatmul.msk.f32.gmra.mxu1 %vm125_vm0, %v1633_v27  ;;  %999 = vmatpush.msra.mxu2 %v698_v6  ;;  %v785_v6 = vld [vmem:[%s2782_s3 + $0x3b8] sm:$0xff] }
  0x74   :  { %1473 = vmatmul.msk.f32.gmra.mxu3 %vm125_vm0, %v1633_v27  ;;  %970 = vmatpush.msra.mxu1 %v682_v2  ;;  %v761_v27 = vld [vmem:[%s2782_s3 + $0x2f8] sm:$0xff]  ;;  %v768_v2 = vld [vmem:[%s2782_s3 + $0x330] sm:$0xff] }
  0x75   :  { %1043 = vmatpush.msrb.mxu0 %v744_v5  ;;  %1027 = vmatpush.msra.mxu3 %v715_v7  ;;  %v733_v5 = vld [vmem:[%s2782_s3 + $0x218] sm:$0xff] }
  0x76   :  { %1071 = vmatpush.msrb.mxu1 %v761_v27  ;;  %1100 = vmatpush.msrb.mxu2 %v777_v11  ;;  %v784_v11 = vld [vmem:[%s2782_s3 + $0x3b0] sm:$0xff] }
  0x77   :  { %1044 = vmatpush.msrb.mxu0 %v743_v8  ;;  %1028 = vmatpush.msra.mxu3 %v714_v10  ;;  %v750_v8 = vld [vmem:[%s2782_s3 + $0x2a0] sm:$0xff] }
  0x78   :  { %1072 = vmatpush.msrb.mxu1 %v760_v9  ;;  %1101 = vmatpush.msrb.mxu2 %v776_v16  ;;  %v767_v9 = vld [vmem:[%s2782_s3 + $0x328] sm:$0xff]  ;;  %v766_v16 = vld [vmem:[%s2782_s3 + $0x320] sm:$0xff] }
  0x79   :  { %1462 = vmatmul.msk.f32.gmra.mxu0 %vm125_vm0, %v1682_v40  ;;  %1129 = vmatpush.msrb.mxu3 %v793_v15  ;;  %v749_v15 = vld [vmem:[%s2782_s3 + $0x298] sm:$0xff] }
  0x7a   :  { %1470 = vmatmul.msk.f32.gmra.mxu2 %vm125_vm0, %v1682_v40  ;;  %1045 = vmatpush.msrb.mxu0 %v742_v12  ;;  %v732_v12 = vld [vmem:[%s2782_s3 + $0x210] sm:$0xff] }
  0x7b   :  { %1466 = vmatmul.msk.f32.gmra.mxu1 %vm125_vm0, %v1682_v40  ;;  %1102 = vmatpush.msrb.mxu2 %v775_v18 }
  0x7c   :  { %1474 = vmatmul.msk.f32.gmra.mxu3 %vm125_vm0, %v1682_v40  ;;  %1073 = vmatpush.msrb.mxu1 %v759_v13  ;;  %v758_v40 = vld [vmem:[%s2782_s3 + $0x2e0] sm:$0xff] }
  0x7d   :  { %1046 = vmatpush.msrb.mxu0 %v741_v17  ;;  %1130 = vmatpush.msrb.mxu3 %v792_v20 }
  0x7e   :  { %1074 = vmatpush.msrb.mxu1 %v758_v40  ;;  %1103 = vmatpush.msrb.mxu2 %v774_v23  ;;  %v783_v40 = vld [vmem:[%s2782_s3 + $0x3a8] sm:$0xff]  ;;  %v748_v23 = vld [vmem:[%s2782_s3 + $0x290] sm:$0xff] }
  0x7f   :  { %1047 = vmatpush.msrb.mxu0 %v740_v21  ;;  %1131 = vmatpush.msrb.mxu3 %v791_v25 }
  0x80   :  { %1075 = vmatpush.msrb.mxu1 %v757_v22  ;;  %1104 = vmatpush.msrb.mxu2 %v773_v29  ;;  %v731_v22 = vld [vmem:[%s2782_s3 + $0x208] sm:$0xff] }
  0x81   :  { %1463 = vmatmul.msk.f32.gmra.mxu0 %vm125_vm0, %v1707_v45  ;;  %1132 = vmatpush.msrb.mxu3 %v790_v31 }
  0x82   :  { %1471 = vmatmul.msk.f32.gmra.mxu2 %vm125_vm0, %v1707_v45  ;;  %1048 = vmatpush.msrb.mxu0 %v739_v26 }
  0x83   :  { %1467 = vmatmul.msk.f32.gmra.mxu1 %vm125_vm0, %v1707_v45  ;;  %1105 = vmatpush.msrb.mxu2 %v772_v34 }
  0x84   :  { %1475 = vmatmul.msk.f32.gmra.mxu3 %vm125_vm0, %v1707_v45  ;;  %v738_v45 = vld [vmem:[%s2782_s3 + $0x240] sm:$0xff]  ;;  %1076 = vmatpush.msrb.mxu1 %v756_v28  ;;  %v765_v28 = vld [vmem:[%s2782_s3 + $0x318] sm:$0xff] }
  0x85   :  { %1049 = vmatpush.msrb.mxu0 %v738_v45  ;;  %1133 = vmatpush.msrb.mxu3 %v789_v36  ;;  %v730_v45 = vld [vmem:[%s2782_s3 + $0x200] sm:$0xff]  ;;  %v764_v36 = vld [vmem:[%s2782_s3 + $0x310] sm:$0xff] }
  0x86   :  { %v155_v32 = vpop.f32.mrf.mxu0  ;;  %1077 = vmatpush.msrb.mxu1 %v755_v33  ;;  %1106 = vmatpush.msrb.mxu2 %v771_v44  ;;  %v782_v33 = vld [vmem:[%s2782_s3 + $0x3a0] sm:$0xff]  ;;  %v763_v44 = vld [vmem:[%s2782_s3 + $0x308] sm:$0xff] }
  0x87   :  { %v156_v35 = vadd.f32 %v155_v32, %v2126_v24  ;;  %1050 = vmatpush.msrb.mxu0 %v737_v37  ;;  %1134 = vmatpush.msrb.mxu3 %v788_v46 }
  0x88   :  { %v184_v38 = vpop.f32.mrf.mxu1  ;;  %1078 = vmatpush.msrb.mxu1 %v754_v39  ;;  %1107 = vmatpush.msrb.mxu2 %v770_v50  ;;  %v809_v39 = vld [vmem:[%s2782_s3 + $0x478] sm:$0xff] }
  0x89   :  { %v602_v41 = vmax.f32 %v156_v35, 0.0  ;;  %v185_v42 = vadd.f32 %v184_v38, %v2143_v30  ;;  %1051 = vmatpush.msrb.mxu0 %v736_v47  ;;  %1135 = vmatpush.msrb.mxu3 %v787_v53  ;;  %v747_v35 = vld [vmem:[%s2782_s3 + $0x288] sm:$0xff]  ;;  %v781_v38 = vld [vmem:[%s2782_s3 + $0x398] sm:$0xff]  ;;  %v780_v47 = vld [vmem:[%s2782_s3 + $0x390] sm:$0xff] }
  0x8a   :  { %1079 = vmatpush.msrb.mxu1 %v753_v49  ;;  %1108 = vmatpush.msrb.mxu2 %v769_v57  ;;  %v825_v53 = vld [vmem:[%s2782_s3 + $0x4f8] sm:$0xff] }
  0x8b   :  { %v603_v48 = vmax.f32 %v185_v42, 0.0  ;;  %942 = vmatmul.f32.vlgmr.msra.gmra.mxu0 %v602_v41  ;;  %1136 = vmatpush.msrb.mxu3 %v786_v14  ;;  %v746_v42 = vld [vmem:[%s2782_s3 + $0x280] sm:$0xff] }
  0x8c   :  { %v213_v51 = vpop.f32.mrf.mxu2  ;;  %1052 = vmatpush.msrb.mxu0 %v735_v54  ;;  %1080 = vmatpush.msrb.mxu1 %v752_v56 }
  0x8d   :  { %v214_v55 = vadd.f32 %v213_v51, %v2169_v43  ;;  %971 = vmatmul.f32.vlgmr.msra.gmra.mxu1 %v603_v48  ;;  %1109 = vmatpush.msrb.mxu2 %v768_v2  ;;  %v808_v51 = vld [vmem:[%s2782_s3 + $0x470] sm:$0xff] }
  0x8e   :  { %v158_v58 = vpop.f32.mrf.mxu0  ;;  %1053 = vmatpush.msrb.mxu0 %v734_v62  ;;  %1081 = vmatpush.msrb.mxu1 %v751_v63  ;;  %v841_v62 = vld [vmem:[%s2782_s3 + $0x578] sm:$0xff] }
  0x8f   :  { %v604_v59 = vmax.f32 %v214_v55, 0.0  ;;  %v159_v60 = vadd.f32 %v158_v58, %v2126_v24  ;;  %v242_v61 = vpop.f32.mrf.mxu3  ;;  %1137 = vmatpush.msrb.mxu3 %v785_v6  ;;  %1110 = vmatpush.msrb.mxu2 %v767_v9  ;;  %v807_v58 = vld [vmem:[%s2782_s3 + $0x468] sm:$0xff]  ;;  %v805_v9 = vld [vmem:[%s2782_s3 + $0x458] sm:$0xff] }
  0x90   :  { %v243_v0 = vadd.f32 %v242_v61, %v2187_v52  ;;  %v187_v1 = vpop.f32.mrf.mxu1  ;;  %1054 = vmatpush.msrb.mxu0 %v733_v5  ;;  %1082 = vmatpush.msrb.mxu1 %v750_v8  ;;  %v2304_v61 = vperm.slane %v2105_v19, 4  ;;  %v840_v5 = vld [vmem:[%s2782_s3 + $0x570] sm:$0xff] }
  0x91   :  { %v188_v3 = vadd.f32 %v187_v1, %v2143_v30  ;;  %1000 = vmatmul.f32.vlgmr.msra.gmra.mxu2 %v604_v59  ;;  %v618_v4 = vmax.f32 %v159_v60, 0.0  ;;  %1138 = vmatpush.msrb.mxu3 %v784_v11  ;;  %v779_v59 = vld [vmem:[%s2782_s3 + $0x388] sm:$0xff]  ;;  %v806_v1 = vld [vmem:[%s2782_s3 + $0x460] sm:$0xff] }
  0x92   :  { %v605_v27 = vmax.f32 %v243_v0, 0.0  ;;  %1055 = vmatpush.msrb.mxu0 %v732_v12  ;;  %1083 = vmatpush.msrb.mxu1 %v749_v15  ;;  %v778_v0 = vld [vmem:[%s2782_s3 + $0x380] sm:$0xff] }
  0x93   :  { %945 = vmatmul.f32.gmra.mxu0 %v618_v4  ;;  %v619_v7 = vmax.f32 %v188_v3, 0.0  ;;  %1111 = vmatpush.msrb.mxu2 %v766_v16  ;;  %v2320_v3 = vperm.slane %v2105_v19, 5  ;;  %v823_v4 = vld [vmem:[%s2782_s3 + $0x4e8] sm:$0xff] }
  0x94   :  { %1029 = vmatmul.f32.vlgmr.msra.gmra.mxu3 %v605_v27  ;;  %v216_v10 = vpop.f32.mrf.mxu2  ;;  %1056 = vmatpush.msrb.mxu0 %v731_v22  ;;  %v838_v22 = vld [vmem:[%s2782_s3 + $0x560] sm:$0xff] }
  0x95   :  { %v217_v13 = vadd.f32 %v216_v10, %v2169_v43  ;;  %974 = vmatmul.f32.gmra.mxu1 %v619_v7  ;;  %1139 = vmatpush.msrb.mxu3 %v783_v40  ;;  %v822_v10 = vld [vmem:[%s2782_s3 + $0x4e0] sm:$0xff]  ;;  %v804_v40 = vld [vmem:[%s2782_s3 + $0x450] sm:$0xff] }
  0x96   :  { %v161_v17 = vpop.f32.mrf.mxu0  ;;  %1084 = vmatpush.msrb.mxu1 %v748_v23  ;;  %1112 = vmatpush.msrb.mxu2 %v765_v28  ;;  %v803_v28 = vld [vmem:[%s2782_s3 + $0x448] sm:$0xff] }
  0x97   :  { %v162_v18 = vadd.f32 %v161_v17, %v2126_v24  ;;  %v245_v20 = vpop.f32.mrf.mxu3  ;;  %v620_v21 = vmax.f32 %v217_v13, 0.0  ;;  %1057 = vmatpush.msrb.mxu0 %v730_v45  ;;  %1140 = vmatpush.msrb.mxu3 %v782_v33  ;;  %v839_v13 = vld [vmem:[%s2782_s3 + $0x568] sm:$0xff]  ;;  %v2344_v17 = vperm.slane %v2105_v19, 6 }
  0x98   :  { %v246_v25 = vadd.f32 %v245_v20, %v2187_v52  ;;  %v190_v26 = vpop.f32.mrf.mxu1  ;;  %1085 = vmatpush.msrb.mxu1 %v747_v35  ;;  %1113 = vmatpush.msrb.mxu2 %v764_v36  ;;  %v802_v36 = vld [vmem:[%s2782_s3 + $0x440] sm:$0xff] }
  0x99   :  { %v191_v29 = vadd.f32 %v190_v26, %v2143_v30  ;;  %1003 = vmatmul.f32.gmra.mxu2 %v620_v21  ;;  %v634_v31 = vmax.f32 %v162_v18, 0.0  ;;  %1141 = vmatpush.msrb.mxu3 %v781_v38  ;;  %v856_v18 = vld [vmem:[%s2782_s3 + $0x5f0] sm:$0xff]  ;;  %v821_v21 = vld [vmem:[%s2782_s3 + $0x4d8] sm:$0xff]  ;;  %v855_v26 = vld [vmem:[%s2782_s3 + $0x5e8] sm:$0xff] }
  0x9a   :  { %v621_v32 = vmax.f32 %v246_v25, 0.0  ;;  %1158 = vmatpush.msra.mxu0 %v809_v39  ;;  %1086 = vmatpush.msrb.mxu1 %v746_v42  ;;  %v2359_v25 = vperm.slane %v2105_v19, 7  ;;  %v837_v19 = vld [vmem:[%s2782_s3 + $0x558] sm:$0xff] }
  0x9b   :  { %948 = vmatmul.f32.gmra.mxu0 %v634_v31  ;;  %v635_v34 = vmax.f32 %v191_v29, 0.0  ;;  %1114 = vmatpush.msrb.mxu2 %v763_v44  ;;  %v820_v31 = vld [vmem:[%s2782_s3 + $0x4d0] sm:$0xff] }
  0x9c   :  { %1032 = vmatmul.f32.gmra.mxu3 %v621_v32  ;;  %1159 = vmatpush.msra.mxu0 %v808_v51  ;;  %v854_v32 = vld [vmem:[%s2782_s3 + $0x5e0] sm:$0xff]  ;;  %v835_v51 = vld [vmem:[%s2782_s3 + $0x548] sm:$0xff] }
  0x9d   :  { %v219_v37 = vpop.f32.mrf.mxu2  ;;  %977 = vmatmul.f32.gmra.mxu1 %v635_v34  ;;  %1142 = vmatpush.msrb.mxu3 %v780_v47 }
  0x9e   :  { %v220_v41 = vadd.f32 %v219_v37, %v2169_v43  ;;  %v164_v46 = vpop.f32.mrf.mxu0  ;;  %1187 = vmatpush.msra.mxu1 %v825_v53  ;;  %1160 = vmatpush.msra.mxu0 %v807_v58  ;;  %v819_v37 = vld [vmem:[%s2782_s3 + $0x4c8] sm:$0xff] }
  0x9f   :  { %v165_v48 = vadd.f32 %v164_v46, %v2126_v24  ;;  %v248_v49 = vpop.f32.mrf.mxu3  ;;  %v762_v24 = vld [vmem:[%s2782_s3 + $0x300] sm:$0xff]  ;;  %1143 = vmatpush.msrb.mxu3 %v779_v59  ;;  %v801_v46 = vld [vmem:[%s2782_s3 + $0x438] sm:$0xff] }
  0xa0   :  { %v636_v50 = vmax.f32 %v220_v41, 0.0  ;;  %v249_v54 = vadd.f32 %v248_v49, %v2187_v52  ;;  %v193_v55 = vpop.f32.mrf.mxu1  ;;  %1115 = vmatpush.msrb.mxu2 %v762_v24  ;;  %1161 = vmatpush.msra.mxu0 %v806_v1  ;;  %v836_v41 = vld [vmem:[%s2782_s3 + $0x550] sm:$0xff] }
  0xa1   :  { %v194_v56 = vadd.f32 %v193_v55, %v2143_v30  ;;  %v650_v57 = vmax.f32 %v165_v48, 0.0  ;;  %v824_v30 = vld [vmem:[%s2782_s3 + $0x4f0] sm:$0xff]  ;;  %1144 = vmatpush.msrb.mxu3 %v778_v0  ;;  %v853_v48 = vld [vmem:[%s2782_s3 + $0x5d8] sm:$0xff] }
  0xa2   :  { %1006 = vmatmul.f32.gmra.mxu2 %v636_v50  ;;  %v637_v14 = vmax.f32 %v249_v54, 0.0  ;;  %1188 = vmatpush.msra.mxu1 %v824_v30  ;;  %v818_v50 = vld [vmem:[%s2782_s3 + $0x4c0] sm:$0xff]  ;;  %v852_v54 = vld [vmem:[%s2782_s3 + $0x5d0] sm:$0xff] }
  0xa3   :  { %951 = vmatmul.f32.gmra.mxu0 %v650_v57  ;;  %v651_v60 = vmax.f32 %v194_v56, 0.0  ;;  %1216 = vmatpush.msra.mxu2 %v841_v62  ;;  %v800_v55 = vld [vmem:[%s2782_s3 + $0x430] sm:$0xff]  ;;  %v817_v56 = vld [vmem:[%s2782_s3 + $0x4b8] sm:$0xff]  ;;  %v834_v57 = vld [vmem:[%s2782_s3 + $0x540] sm:$0xff] }
  0xa4   :  { %1035 = vmatmul.f32.gmra.mxu3 %v637_v14  ;;  %1189 = vmatpush.msra.mxu1 %v823_v4  ;;  %v851_v14 = vld [vmem:[%s2782_s3 + $0x5c8] sm:$0xff] }
  0xa5   :  { %v222_v63 = vpop.f32.mrf.mxu2  ;;  %980 = vmatmul.f32.gmra.mxu1 %v651_v60  ;;  %1217 = vmatpush.msra.mxu2 %v840_v5  ;;  %v799_v62 = vld [vmem:[%s2782_s3 + $0x428] sm:$0xff] }
  0xa6   :  { %v223_v2 = vadd.f32 %v222_v63, %v2169_v43  ;;  %v271_v27 = vpop.f32.mrf.mxu0  ;;  %v857_v43 = vld [vmem:[%s2782_s3 + $0x5f8] sm:$0xff]  ;;  %1162 = vmatpush.msra.mxu0 %v805_v9  ;;  %1190 = vmatpush.msra.mxu1 %v822_v10  ;;  %v816_v63 = vld [vmem:[%s2782_s3 + $0x4b0] sm:$0xff] }
  0xa7   :  { %v251_v6 = vpop.f32.mrf.mxu3  ;;  %v272_v7 = vadd.f32 %v271_v27, %v2304_v61  ;;  %1245 = vmatpush.msra.mxu3 %v857_v43  ;;  %1218 = vmatpush.msra.mxu2 %v839_v13  ;;  %v798_v27 = vld [vmem:[%s2782_s3 + $0x420] sm:$0xff]  ;;  %v832_v9 = vld [vmem:[%s2782_s3 + $0x530] sm:$0xff] }
  0xa8   :  { %v652_v8 = vmax.f32 %v223_v2, 0.0  ;;  %v252_v11 = vadd.f32 %v251_v6, %v2187_v52  ;;  %v300_v12 = vpop.f32.mrf.mxu1  ;;  %1163 = vmatpush.msra.mxu0 %v804_v40  ;;  %1191 = vmatpush.msra.mxu1 %v821_v21  ;;  %v833_v2 = vld [vmem:[%s2782_s3 + $0x538] sm:$0xff]  ;;  %v850_v6 = vld [vmem:[%s2782_s3 + $0x5c0] sm:$0xff] }
  0xa9   :  { %v606_v15 = vmax.f32 %v272_v7, 0.0  ;;  %v301_v16 = vadd.f32 %v300_v12, %v2320_v3  ;;  %1246 = vmatpush.msra.mxu3 %v856_v18  ;;  %1219 = vmatpush.msra.mxu2 %v838_v22  ;;  %v797_v12 = vld [vmem:[%s2782_s3 + $0x418] sm:$0xff]  ;;  %v796_v22 = vld [vmem:[%s2782_s3 + $0x410] sm:$0xff] }
  0xaa   :  { %1009 = vmatmul.f32.gmra.mxu2 %v652_v8  ;;  %v653_v52 = vmax.f32 %v252_v11, 0.0  ;;  %1164 = vmatpush.msra.mxu0 %v803_v28  ;;  %v815_v8 = vld [vmem:[%s2782_s3 + $0x4a8] sm:$0xff]  ;;  %v849_v11 = vld [vmem:[%s2782_s3 + $0x5b8] sm:$0xff] }
  0xab   :  { %v607_v20 = vmax.f32 %v301_v16, 0.0  ;;  %1058 = vmatmul.f32.vlgmr.msrb.gmra.mxu0 %v606_v15  ;;  %1247 = vmatpush.msra.mxu3 %v855_v26  ;;  %v814_v15 = vld [vmem:[%s2782_s3 + $0x4a0] sm:$0xff]  ;;  %v831_v16 = vld [vmem:[%s2782_s3 + $0x528] sm:$0xff] }
  0xac   :  { %1038 = vmatmul.f32.gmra.mxu3 %v653_v52  ;;  %1192 = vmatpush.msra.mxu1 %v820_v31  ;;  %v848_v52 = vld [vmem:[%s2782_s3 + $0x5b0] sm:$0xff] }
  0xad   :  { %v329_v23 = vpop.f32.mrf.mxu2  ;;  %1087 = vmatmul.f32.vlgmr.msrb.gmra.mxu1 %v607_v20  ;;  %1220 = vmatpush.msra.mxu2 %v837_v19 }
  0xae   :  { %v330_v29 = vadd.f32 %v329_v23, %v2344_v17  ;;  %v274_v45 = vpop.f32.mrf.mxu0  ;;  %1248 = vmatpush.msra.mxu3 %v854_v32  ;;  %1165 = vmatpush.msra.mxu0 %v802_v36  ;;  %v813_v23 = vld [vmem:[%s2782_s3 + $0x498] sm:$0xff] }
  0xaf   :  { %v275_v34 = vadd.f32 %v274_v45, %v2304_v61  ;;  %v358_v35 = vpop.f32.mrf.mxu3  ;;  %1193 = vmatpush.msra.mxu1 %v819_v37  ;;  %1221 = vmatpush.msra.mxu2 %v836_v41  ;;  %v795_v45 = vld [vmem:[%s2782_s3 + $0x408] sm:$0xff]  ;;  %v829_v36 = vld [vmem:[%s2782_s3 + $0x518] sm:$0xff] }
  0xb0   :  { %v608_v33 = vmax.f32 %v330_v29, 0.0  ;;  %v359_v38 = vadd.f32 %v358_v35, %v2359_v25  ;;  %v303_v39 = vpop.f32.mrf.mxu1  ;;  %1166 = vmatpush.msra.mxu0 %v801_v46  ;;  %1249 = vmatpush.msra.mxu3 %v853_v48  ;;  %v830_v29 = vld [vmem:[%s2782_s3 + $0x520] sm:$0xff]  ;;  %v828_v46 = vld [vmem:[%s2782_s3 + $0x510] sm:$0xff] }
  0xb1   :  { %v304_v42 = vadd.f32 %v303_v39, %v2320_v3  ;;  %v622_v44 = vmax.f32 %v275_v34, 0.0  ;;  %1194 = vmatpush.msra.mxu1 %v818_v50  ;;  %1222 = vmatpush.msra.mxu2 %v835_v51  ;;  %v794_v39 = vld [vmem:[%s2782_s3 + $0x400] sm:$0xff] }
  0xb2   :  { %1116 = vmatmul.f32.vlgmr.msrb.gmra.mxu2 %v608_v33  ;;  %v609_v47 = vmax.f32 %v359_v38, 0.0  ;;  %1250 = vmatpush.msra.mxu3 %v852_v54  ;;  %v847_v33 = vld [vmem:[%s2782_s3 + $0x5a8] sm:$0xff]  ;;  %v846_v38 = vld [vmem:[%s2782_s3 + $0x5a0] sm:$0xff] }
  0xb3   :  { %1061 = vmatmul.f32.gmra.mxu0 %v622_v44  ;;  %v623_v49 = vmax.f32 %v304_v42, 0.0  ;;  %1195 = vmatpush.msra.mxu1 %v817_v56  ;;  %v811_v44 = vld [vmem:[%s2782_s3 + $0x488] sm:$0xff]  ;;  %v810_v51 = vld [vmem:[%s2782_s3 + $0x480] sm:$0xff] }
  0xb4   :  { %1145 = vmatmul.f32.vlgmr.msrb.gmra.mxu3 %v609_v47  ;;  %1167 = vmatpush.msra.mxu0 %v800_v55 }
  0xb5   :  { %v332_v53 = vpop.f32.mrf.mxu2  ;;  %1090 = vmatmul.f32.gmra.mxu1 %v623_v49  ;;  %1223 = vmatpush.msra.mxu2 %v834_v57 }
  0xb6   :  { %v333_v24 = vadd.f32 %v332_v53, %v2344_v17  ;;  %v277_v58 = vpop.f32.mrf.mxu0  ;;  %1251 = vmatpush.msra.mxu3 %v851_v14  ;;  %1168 = vmatpush.msra.mxu0 %v799_v62  ;;  %v873_v53 = vld [vmem:[%s2782_s3 + $0x678] sm:$0xff]  ;;  %v872_v14 = vld [vmem:[%s2782_s3 + $0x670] sm:$0xff]  ;;  %v826_v62 = vld [vmem:[%s2782_s3 + $0x500] sm:$0xff] }
  0xb7   :  { %v278_v59 = vadd.f32 %v277_v58, %v2304_v61  ;;  %v361_v60 = vpop.f32.mrf.mxu3  ;;  %1196 = vmatpush.msra.mxu1 %v816_v63  ;;  %1224 = vmatpush.msra.mxu2 %v833_v2  ;;  %v871_v2 = vld [vmem:[%s2782_s3 + $0x668] sm:$0xff] }
  0xb8   :  { %v624_v30 = vmax.f32 %v333_v24, 0.0  ;;  %v362_v0 = vadd.f32 %v361_v60, %v2359_v25  ;;  %v306_v1 = vpop.f32.mrf.mxu1  ;;  %1169 = vmatpush.msra.mxu0 %v798_v27  ;;  %1252 = vmatpush.msra.mxu3 %v850_v6  ;;  %v827_v24 = vld [vmem:[%s2782_s3 + $0x508] sm:$0xff]  ;;  %v905_v27 = vld [vmem:[%s2782_s3 + $0x778] sm:$0xff]  ;;  %v842_v6 = vld [vmem:[%s2782_s3 + $0x580] sm:$0xff] }
  0xb9   :  { %v307_v4 = vadd.f32 %v306_v1, %v2320_v3  ;;  %v638_v5 = vmax.f32 %v278_v59, 0.0  ;;  %1197 = vmatpush.msra.mxu1 %v815_v8  ;;  %1225 = vmatpush.msra.mxu2 %v832_v9  ;;  %v844_v59 = vld [vmem:[%s2782_s3 + $0x590] sm:$0xff]  ;;  %v843_v1 = vld [vmem:[%s2782_s3 + $0x588] sm:$0xff] }
  0xba   :  { %1119 = vmatmul.f32.gmra.mxu2 %v624_v30  ;;  %v625_v43 = vmax.f32 %v362_v0, 0.0  ;;  %1253 = vmatpush.msra.mxu3 %v849_v11  ;;  %v889_v30 = vld [vmem:[%s2782_s3 + $0x6f8] sm:$0xff]  ;;  %v887_v11 = vld [vmem:[%s2782_s3 + $0x6e8] sm:$0xff] }
  0xbb   :  { %1064 = vmatmul.f32.gmra.mxu0 %v638_v5  ;;  %v639_v7 = vmax.f32 %v307_v4, 0.0  ;;  %1198 = vmatpush.msra.mxu1 %v814_v15  ;;  %v888_v5 = vld [vmem:[%s2782_s3 + $0x6f0] sm:$0xff] }
  0xbc   :  { %1148 = vmatmul.f32.gmra.mxu3 %v625_v43  ;;  %1170 = vmatpush.msra.mxu0 %v797_v12  ;;  %v904_v15 = vld [vmem:[%s2782_s3 + $0x770] sm:$0xff] }
  0xbd   :  { %v335_v10 = vpop.f32.mrf.mxu2  ;;  %1093 = vmatmul.f32.gmra.mxu1 %v639_v7  ;;  %1226 = vmatpush.msra.mxu2 %v831_v16 }
  0xbe   :  { %v336_v13 = vadd.f32 %v335_v10, %v2344_v17  ;;  %v280_v40 = vpop.f32.mrf.mxu0  ;;  %1254 = vmatpush.msra.mxu3 %v848_v52  ;;  %1171 = vmatpush.msra.mxu0 %v796_v22  ;;  %v870_v10 = vld [vmem:[%s2782_s3 + $0x660] sm:$0xff]  ;;  %v869_v52 = vld [vmem:[%s2782_s3 + $0x658] sm:$0xff] }
  0xbf   :  { %v281_v18 = vadd.f32 %v280_v40, %v2304_v61  ;;  %v364_v20 = vpop.f32.mrf.mxu3  ;;  %v2468_v61 = vld [vmem:[%s2781_s2 + $0x8] sm:$0xff]  ;;  %1199 = vmatpush.msra.mxu1 %v813_v23  ;;  %1227 = vmatpush.msra.mxu2 %v830_v29  ;;  %v868_v29 = vld [vmem:[%s2782_s3 + $0x650] sm:$0xff] }
  0xc0   :  { %v640_v21 = vmax.f32 %v336_v13, 0.0  ;;  %v365_v26 = vadd.f32 %v364_v20, %v2359_v25  ;;  %v309_v28 = vpop.f32.mrf.mxu1  ;;  %v2481_v35 = vperm.slane %v2468_v61, 0  ;;  %1172 = vmatpush.msra.mxu0 %v795_v45  ;;  %1255 = vmatpush.msra.mxu3 %v847_v33  ;;  %v2497_v42 = vperm.slane %v2468_v61, 1  ;;  %v921_v20 = vld [vmem:[%s2782_s3 + $0x7f8] sm:$0xff]  ;;  %v903_v23 = vld [vmem:[%s2782_s3 + $0x768] sm:$0xff]  ;;  %v902_v45 = vld [vmem:[%s2782_s3 + $0x760] sm:$0xff] }
  0xc1   :  { %v310_v31 = vadd.f32 %v309_v28, %v2320_v3  ;;  %v654_v19 = vmax.f32 %v281_v18, 0.0  ;;  %v812_v3 = vld [vmem:[%s2782_s3 + $0x490] sm:$0xff]  ;;  %1228 = vmatpush.msra.mxu2 %v829_v36  ;;  %v2521_v58 = vperm.slane %v2468_v61, 2  ;;  %v2536_v0 = vperm.slane %v2468_v61, 3  ;;  %v919_v33 = vld [vmem:[%s2782_s3 + $0x7e8] sm:$0xff] }
  0xc2   :  { %1122 = vmatmul.f32.gmra.mxu2 %v640_v21  ;;  %v641_v32 = vmax.f32 %v365_v26, 0.0  ;;  %1200 = vmatpush.msra.mxu1 %v812_v3  ;;  %v886_v21 = vld [vmem:[%s2782_s3 + $0x6e0] sm:$0xff]  ;;  %v920_v28 = vld [vmem:[%s2782_s3 + $0x7f0] sm:$0xff] }
  0xc3   :  { %1067 = vmatmul.f32.gmra.mxu0 %v654_v19  ;;  %v655_v34 = vmax.f32 %v310_v31, 0.0  ;;  %1256 = vmatpush.msra.mxu3 %v846_v38  ;;  %v885_v19 = vld [vmem:[%s2782_s3 + $0x6d8] sm:$0xff]  ;;  %v884_v38 = vld [vmem:[%s2782_s3 + $0x6d0] sm:$0xff] }
  0xc4   :  { %1151 = vmatmul.f32.gmra.mxu3 %v641_v32  ;;  %1173 = vmatpush.msra.mxu0 %v794_v39 }
  0xc5   :  { %v338_v37 = vpop.f32.mrf.mxu2  ;;  %1096 = vmatmul.f32.gmra.mxu1 %v655_v34  ;;  %1229 = vmatpush.msra.mxu2 %v828_v46  ;;  %v867_v34 = vld [vmem:[%s2782_s3 + $0x648] sm:$0xff]  ;;  %v918_v46 = vld [vmem:[%s2782_s3 + $0x7e0] sm:$0xff] }
  0xc6   :  { %v339_v41 = vadd.f32 %v338_v37, %v2344_v17  ;;  %v387_v47 = vpop.f32.mrf.mxu0  ;;  %v845_v17 = vld [vmem:[%s2782_s3 + $0x598] sm:$0xff]  ;;  %1201 = vmatpush.msra.mxu1 %v811_v44  ;;  %1274 = vmatpush.msrb.mxu0 %v873_v53 }
  0xc7   :  { %v367_v48 = vpop.f32.mrf.mxu3  ;;  %v388_v49 = vadd.f32 %v387_v47, %v2481_v35  ;;  %1257 = vmatpush.msra.mxu3 %v845_v17  ;;  %1230 = vmatpush.msra.mxu2 %v827_v24  ;;  %v901_v44 = vld [vmem:[%s2782_s3 + $0x758] sm:$0xff] }
  0xc8   :  { %v656_v50 = vmax.f32 %v339_v41, 0.0  ;;  %v368_v54 = vadd.f32 %v367_v48, %v2359_v25  ;;  %v416_v55 = vpop.f32.mrf.mxu1  ;;  %1202 = vmatpush.msra.mxu1 %v810_v51  ;;  %1275 = vmatpush.msrb.mxu0 %v872_v14  ;;  %v866_v48 = vld [vmem:[%s2782_s3 + $0x640] sm:$0xff]  ;;  %v900_v51 = vld [vmem:[%s2782_s3 + $0x750] sm:$0xff]  ;;  %v917_v53 = vld [vmem:[%s2782_s3 + $0x7d8] sm:$0xff] }
  0xc9   :  { %v610_v56 = vmax.f32 %v388_v49, 0.0  ;;  %v417_v57 = vadd.f32 %v416_v55, %v2497_v42  ;;  %1258 = vmatpush.msra.mxu3 %v844_v59  ;;  %1231 = vmatpush.msra.mxu2 %v826_v62  ;;  %v883_v49 = vld [vmem:[%s2782_s3 + $0x6c8] sm:$0xff]  ;;  %v865_v24 = vld [vmem:[%s2782_s3 + $0x638] sm:$0xff] }
  0xca   :  { %1125 = vmatmul.f32.gmra.mxu2 %v656_v50  ;;  %v657_v25 = vmax.f32 %v368_v54, 0.0  ;;  %1303 = vmatpush.msrb.mxu1 %v889_v30  ;;  %v899_v14 = vld [vmem:[%s2782_s3 + $0x748] sm:$0xff] }
  0xcb   :  { %v611_v60 = vmax.f32 %v417_v57, 0.0  ;;  %1174 = vmatmul.f32.vlgmr.msra.gmra.mxu0 %v610_v56  ;;  %1259 = vmatpush.msra.mxu3 %v843_v1  ;;  %v882_v56 = vld [vmem:[%s2782_s3 + $0x6c0] sm:$0xff] }
  0xcc   :  { %1154 = vmatmul.f32.gmra.mxu3 %v657_v25  ;;  %1276 = vmatpush.msrb.mxu0 %v871_v2  ;;  %v916_v25 = vld [vmem:[%s2782_s3 + $0x7d0] sm:$0xff]  ;;  %v898_v1 = vld [vmem:[%s2782_s3 + $0x740] sm:$0xff] }
  0xcd   :  { %v445_v63 = vpop.f32.mrf.mxu2  ;;  %1203 = vmatmul.f32.vlgmr.msra.gmra.mxu1 %v611_v60  ;;  %1332 = vmatpush.msrb.mxu2 %v905_v27  ;;  %v864_v60 = vld [vmem:[%s2782_s3 + $0x630] sm:$0xff] }
  0xce   :  { %v446_v4 = vadd.f32 %v445_v63, %v2521_v58  ;;  %v390_v43 = vpop.f32.mrf.mxu0  ;;  %1304 = vmatpush.msrb.mxu1 %v888_v5  ;;  %1260 = vmatpush.msra.mxu3 %v842_v6  ;;  %v881_v63 = vld [vmem:[%s2782_s3 + $0x6b8] sm:$0xff]  ;;  %v915_v5 = vld [vmem:[%s2782_s3 + $0x7c8] sm:$0xff] }
  0xcf   :  { %v391_v8 = vadd.f32 %v390_v43, %v2481_v35  ;;  %v474_v9 = vpop.f32.mrf.mxu3  ;;  %1277 = vmatpush.msrb.mxu0 %v870_v10  ;;  %1333 = vmatpush.msrb.mxu2 %v904_v15  ;;  %v880_v43 = vld [vmem:[%s2782_s3 + $0x6b0] sm:$0xff]  ;;  %v913_v15 = vld [vmem:[%s2782_s3 + $0x7b8] sm:$0xff] }
  0xd0   :  { %v612_v7 = vmax.f32 %v446_v4, 0.0  ;;  %v475_v12 = vadd.f32 %v474_v9, %v2536_v0  ;;  %v419_v13 = vpop.f32.mrf.mxu1  ;;  %1305 = vmatpush.msrb.mxu1 %v887_v11  ;;  %1361 = vmatpush.msrb.mxu3 %v921_v20  ;;  %v862_v11 = vld [vmem:[%s2782_s3 + $0x620] sm:$0xff] }
  0xd1   :  { %v626_v16 = vmax.f32 %v391_v8, 0.0  ;;  %v420_v40 = vadd.f32 %v419_v13, %v2497_v42  ;;  %1278 = vmatpush.msrb.mxu0 %v869_v52  ;;  %1334 = vmatpush.msrb.mxu2 %v903_v23  ;;  %v914_v8 = vld [vmem:[%s2782_s3 + $0x7c0] sm:$0xff]  ;;  %v896_v13 = vld [vmem:[%s2782_s3 + $0x730] sm:$0xff] }
  0xd2   :  { %1232 = vmatmul.f32.vlgmr.msra.gmra.mxu2 %v612_v7  ;;  %v613_v18 = vmax.f32 %v475_v12, 0.0  ;;  %1306 = vmatpush.msrb.mxu1 %v886_v21  ;;  %v897_v7 = vld [vmem:[%s2782_s3 + $0x738] sm:$0xff]  ;;  %v878_v20 = vld [vmem:[%s2782_s3 + $0x6a0] sm:$0xff] }
  0xd3   :  { %v627_v22 = vmax.f32 %v420_v40, 0.0  ;;  %1177 = vmatmul.f32.gmra.mxu0 %v626_v16  ;;  %1362 = vmatpush.msrb.mxu3 %v920_v28  ;;  %v2674_v16 = vperm.slane %v2468_v61, 4  ;;  %v2693_v28 = vperm.slane %v2468_v61, 5 }
  0xd4   :  { %1261 = vmatmul.f32.vlgmr.msra.gmra.mxu3 %v613_v18  ;;  %1279 = vmatpush.msrb.mxu0 %v868_v29  ;;  %v861_v18 = vld [vmem:[%s2782_s3 + $0x618] sm:$0xff] }
  0xd5   :  { %v448_v26 = vpop.f32.mrf.mxu2  ;;  %1206 = vmatmul.f32.gmra.mxu1 %v627_v22  ;;  %1335 = vmatpush.msrb.mxu2 %v902_v45  ;;  %v895_v22 = vld [vmem:[%s2782_s3 + $0x728] sm:$0xff]  ;;  %v877_v45 = vld [vmem:[%s2782_s3 + $0x698] sm:$0xff] }
  0xd6   :  { %v449_v31 = vadd.f32 %v448_v26, %v2521_v58  ;;  %v393_v32 = vpop.f32.mrf.mxu0  ;;  %1307 = vmatpush.msrb.mxu1 %v885_v19  ;;  %1363 = vmatpush.msrb.mxu3 %v919_v33  ;;  %v860_v26 = vld [vmem:[%s2782_s3 + $0x610] sm:$0xff] }
  0xd7   :  { %v394_v36 = vadd.f32 %v393_v32, %v2481_v35  ;;  %v477_v37 = vpop.f32.mrf.mxu3  ;;  %1280 = vmatpush.msrb.mxu0 %v867_v34  ;;  %1336 = vmatpush.msrb.mxu2 %v901_v44  ;;  %v894_v32 = vld [vmem:[%s2782_s3 + $0x720] sm:$0xff]  ;;  %v911_v34 = vld [vmem:[%s2782_s3 + $0x7a8] sm:$0xff] }
  0xd8   :  { %v628_v3 = vmax.f32 %v449_v31, 0.0  ;;  %v478_v39 = vadd.f32 %v477_v37, %v2536_v0  ;;  %v422_v41 = vpop.f32.mrf.mxu1  ;;  %1308 = vmatpush.msrb.mxu1 %v884_v38  ;;  %1364 = vmatpush.msrb.mxu3 %v918_v46  ;;  %v893_v38 = vld [vmem:[%s2782_s3 + $0x718] sm:$0xff] }
  0xd9   :  { %v642_v47 = vmax.f32 %v394_v36, 0.0  ;;  %v423_v17 = vadd.f32 %v422_v41, %v2497_v42  ;;  %1281 = vmatpush.msrb.mxu0 %v866_v48  ;;  %1337 = vmatpush.msrb.mxu2 %v900_v51  ;;  %v2713_v36 = vperm.slane %v2468_v61, 6  ;;  %v909_v51 = vld [vmem:[%s2782_s3 + $0x798] sm:$0xff] }
  0xda   :  { %v629_v50 = vmax.f32 %v478_v39, 0.0  ;;  %1235 = vmatmul.f32.gmra.mxu2 %v628_v3  ;;  %1309 = vmatpush.msrb.mxu1 %v883_v49  ;;  %v876_v3 = vld [vmem:[%s2782_s3 + $0x690] sm:$0xff]  ;;  %v910_v39 = vld [vmem:[%s2782_s3 + $0x7a0] sm:$0xff]  ;;  %v2729_v49 = vperm.slane %v2468_v61, 7 }
  0xdb   :  { %v643_v54 = vmax.f32 %v423_v17, 0.0  ;;  %1180 = vmatmul.f32.gmra.mxu0 %v642_v47  ;;  %1365 = vmatpush.msrb.mxu3 %v917_v53  ;;  %v858_v47 = vld [vmem:[%s2782_s3 + $0x600] sm:$0xff]  ;;  %v875_v17 = vld [vmem:[%s2782_s3 + $0x688] sm:$0xff] }
  0xdc   :  { %1264 = vmatmul.f32.gmra.mxu3 %v629_v50  ;;  %1282 = vmatpush.msrb.mxu0 %v865_v24  ;;  %v892_v50 = vld [vmem:[%s2782_s3 + $0x710] sm:$0xff]  ;;  %v874_v61 = vld [vmem:[%s2782_s3 + $0x680] sm:$0xff] }
  0xdd   :  { %v451_v55 = vpop.f32.mrf.mxu2  ;;  %1310 = vmatpush.msrb.mxu1 %v882_v56  ;;  %1338 = vmatpush.msrb.mxu2 %v899_v14  ;;  %v891_v56 = vld [vmem:[%s2782_s3 + $0x708] sm:$0xff]  ;;  %v908_v14 = vld [vmem:[%s2782_s3 + $0x790] sm:$0xff] }
  0xde   :  { %v452_v57 = vadd.f32 %v451_v55, %v2521_v58  ;;  %v396_v59 = vpop.f32.mrf.mxu0  ;;  %1209 = vmatmul.f32.gmra.mxu1 %v643_v54  ;;  %1366 = vmatpush.msrb.mxu3 %v916_v25 }
  0xdf   :  { %v397_v30 = vadd.f32 %v396_v59, %v2481_v35  ;;  %v480_v62 = vpop.f32.mrf.mxu3  ;;  %v863_v35 = vld [vmem:[%s2782_s3 + $0x628] sm:$0xff]  ;;  %1283 = vmatpush.msrb.mxu0 %v864_v60  ;;  %1311 = vmatpush.msrb.mxu1 %v881_v63  ;;  %v890_v60 = vld [vmem:[%s2782_s3 + $0x700] sm:$0xff] }
  0xe0   :  { %v644_v2 = vmax.f32 %v452_v57, 0.0  ;;  %v481_v4 = vadd.f32 %v480_v62, %v2536_v0  ;;  %v425_v27 = vpop.f32.mrf.mxu1  ;;  %1339 = vmatpush.msrb.mxu2 %v898_v1  ;;  %1367 = vmatpush.msrb.mxu3 %v915_v5 }
  0xe1   :  { %v426_v6 = vadd.f32 %v425_v27, %v2497_v42  ;;  %v658_v9 = vmax.f32 %v397_v30, 0.0  ;;  %1284 = vmatpush.msrb.mxu0 %v863_v35  ;;  %v879_v42 = vld [vmem:[%s2782_s3 + $0x6a8] sm:$0xff]  ;;  %1312 = vmatpush.msrb.mxu1 %v880_v43 }
  0xe2   :  { %v645_v10 = vmax.f32 %v481_v4, 0.0  ;;  %1238 = vmatmul.f32.gmra.mxu2 %v644_v2  ;;  %1368 = vmatpush.msrb.mxu3 %v914_v8  ;;  %v907_v30 = vld [vmem:[%s2782_s3 + $0x788] sm:$0xff]  ;;  %v906_v4 = vld [vmem:[%s2782_s3 + $0x780] sm:$0xff] }
  0xe3   :  { %1340 = vmatpush.msrb.mxu2 %v897_v7  ;;  %v659_v40 = vmax.f32 %v426_v6, 0.0  ;;  %1285 = vmatpush.msrb.mxu0 %v862_v11 }
  0xe4   :  { %1313 = vmatpush.msrb.mxu1 %v879_v42  ;;  %1183 = vmatmul.f32.gmra.mxu0 %v658_v9 }
  0xe5   :  { %v454_v12 = vpop.f32.mrf.mxu2  ;;  %1267 = vmatmul.f32.gmra.mxu3 %v645_v10  ;;  %1341 = vmatpush.msrb.mxu2 %v896_v13 }
  0xe6   :  { %v455_v52 = vadd.f32 %v454_v12, %v2521_v58  ;;  %v503_v21 = vpop.f32.mrf.mxu0  ;;  %1369 = vmatpush.msrb.mxu3 %v913_v15  ;;  %v912_v58 = vld [vmem:[%s2782_s3 + $0x7b0] sm:$0xff]  ;;  %1286 = vmatpush.msrb.mxu0 %v861_v18 }
  0xe7   :  { %v483_v23 = vpop.f32.mrf.mxu3  ;;  %1314 = vmatpush.msrb.mxu1 %v878_v20  ;;  %v504_v19 = vadd.f32 %v503_v21, %v2674_v16  ;;  %1342 = vmatpush.msrb.mxu2 %v895_v22 }
  0xe8   :  { %v532_v29 = vpop.f32.mrf.mxu1  ;;  %v484_v31 = vadd.f32 %v483_v23, %v2536_v0  ;;  %v660_v33 = vmax.f32 %v455_v52, 0.0  ;;  %1212 = vmatmul.f32.gmra.mxu1 %v659_v40  ;;  %v859_v0 = vld [vmem:[%s2782_s3 + $0x608] sm:$0xff]  ;;  %1370 = vmatpush.msrb.mxu3 %v912_v58 }
  0xe9   :  { %1287 = vmatpush.msrb.mxu0 %v860_v26  ;;  %1315 = vmatpush.msrb.mxu1 %v877_v45  ;;  %v533_v37 = vadd.f32 %v532_v29, %v2693_v28  ;;  %v614_v46 = vmax.f32 %v504_v19, 0.0  ;;  %v1479_v29 = vld [vmem:[%s2783_s4] ss:$0 sm:$0xff]  ;;  %s1506_s4 = smov [#allocation2]  }
  0xea   :  { %1343 = vmatpush.msrb.mxu2 %v894_v32  ;;  %v661_v44 = vmax.f32 %v484_v31, 0.0  ;;  %1371 = vmatpush.msrb.mxu3 %v911_v34  ;;  %s1398_s25 = sshll.u32 %s1506_s4, 4  ;;  %s1399_s25 = int_to_ptr.vmem [resolvable:$true] %s1398_s25 }
  0xeb   :  { %1288 = vmatpush.msrb.mxu0 %v859_v0  ;;  %1316 = vmatpush.msrb.mxu1 %v876_v3  ;;  %v615_v55 = vmax.f32 %v533_v37, 0.0 }
  0xec   :  { %1241 = vmatmul.f32.gmra.mxu2 %v660_v33  ;;  %1372 = vmatpush.msrb.mxu3 %v910_v39 }
  0xed   :  { %v561_v41 = vpop.f32.mrf.mxu2  ;;  %1344 = vmatpush.msrb.mxu2 %v893_v38  ;;  %1289 = vmatpush.msrb.mxu0 %v858_v47 }
  0xee   :  { %v506_v48 = vpop.f32.mrf.mxu0  ;;  %v562_v53 = vadd.f32 %v561_v41, %v2713_v36  ;;  %1317 = vmatpush.msrb.mxu1 %v875_v17  ;;  %1270 = vmatmul.f32.gmra.mxu3 %v661_v44 }
  0xef   :  { %v590_v54 = vpop.f32.mrf.mxu3  ;;  %1290 = vmatmul.f32.vlgmr.msrb.gmra.mxu0 %v614_v46  ;;  %v507_v57 = vadd.f32 %v506_v48, %v2674_v16  ;;  %1345 = vmatpush.msrb.mxu2 %v892_v50 }
  0xf0   :  { %v535_v24 = vpop.f32.mrf.mxu1  ;;  %1373 = vmatpush.msrb.mxu3 %v909_v51  ;;  %v591_v25 = vadd.f32 %v590_v54, %v2729_v49  ;;  %v616_v59 = vmax.f32 %v562_v53, 0.0  ;;  %1318 = vmatpush.msrb.mxu1 %v874_v61 }
  0xf1   :  { %1319 = vmatmul.f32.vlgmr.msrb.gmra.mxu1 %v615_v55  ;;  %1346 = vmatpush.msrb.mxu2 %v891_v56  ;;  %v536_v62 = vadd.f32 %v535_v24, %v2693_v28  ;;  %v630_v1 = vmax.f32 %v507_v57, 0.0 }
  0xf2   :  { %1374 = vmatpush.msrb.mxu3 %v908_v14  ;;  %v617_v2 = vmax.f32 %v591_v25, 0.0 }
  0xf3   :  { %1347 = vmatpush.msrb.mxu2 %v890_v60  ;;  %v631_v43 = vmax.f32 %v536_v62, 0.0 }
  0xf4   :  { %1375 = vmatpush.msrb.mxu3 %v907_v30  ;;  %1348 = vmatmul.f32.vlgmr.msrb.gmra.mxu2 %v616_v59 }
  0xf5   :  { %v564_v63 = vpop.f32.mrf.mxu2 }
  0xf6   :  { %v509_v5 = vpop.f32.mrf.mxu0  ;;  %v565_v27 = vadd.f32 %v564_v63, %v2713_v36  ;;  %1376 = vmatpush.msrb.mxu3 %v906_v4 }
  0xf7   :  { %v593_v35 = vpop.f32.mrf.mxu3  ;;  %1293 = vmatmul.f32.gmra.mxu0 %v630_v1  ;;  %v510_v7 = vadd.f32 %v509_v5, %v2674_v16  ;;  %1377 = vmatmul.f32.vlgmr.msrb.gmra.mxu3 %v617_v2 }
  0xf8   :  { %v538_v6 = vpop.f32.mrf.mxu1  ;;  %v594_v8 = vadd.f32 %v593_v35, %v2729_v49  ;;  %v632_v9 = vmax.f32 %v565_v27, 0.0 }
  0xf9   :  { %1322 = vmatmul.f32.gmra.mxu1 %v631_v43  ;;  %v539_v10 = vadd.f32 %v538_v6, %v2693_v28  ;;  %v646_v42 = vmax.f32 %v510_v7, 0.0 }
  0xfa   :  { %v633_v12 = vmax.f32 %v594_v8, 0.0 }
  0xfb   :  { %v647_v52 = vmax.f32 %v539_v10, 0.0 }
  0xfc   :  { %1351 = vmatmul.f32.gmra.mxu2 %v632_v9 }
  0xfd   :  { %v567_v11 = vpop.f32.mrf.mxu2 }
  0xfe   :  { %v512_v13 = vpop.f32.mrf.mxu0  ;;  %v568_v15 = vadd.f32 %v567_v11, %v2713_v36 }
  0xff   :  { %v596_v40 = vpop.f32.mrf.mxu3  ;;  %1296 = vmatmul.f32.gmra.mxu0 %v646_v42  ;;  %v513_v18 = vadd.f32 %v512_v13, %v2674_v16  ;;  %1380 = vmatmul.f32.gmra.mxu3 %v633_v12 }
 0x100   :  { %v541_v20 = vpop.f32.mrf.mxu1  ;;  %v597_v21 = vadd.f32 %v596_v40, %v2729_v49  ;;  %v648_v22 = vmax.f32 %v568_v15, 0.0 }
 0x101   :  { %1325 = vmatmul.f32.gmra.mxu1 %v647_v52  ;;  %v542_v23 = vadd.f32 %v541_v20, %v2693_v28  ;;  %v662_v26 = vmax.f32 %v513_v18, 0.0 }
 0x102   :  { %v649_v31 = vmax.f32 %v597_v21, 0.0 }
 0x103   :  { %v663_v16 = vmax.f32 %v542_v23, 0.0 }
 0x104   :  { %1354 = vmatmul.f32.gmra.mxu2 %v648_v22 }
 0x105   :  { %v570_v58 = vpop.f32.mrf.mxu2 }
 0x106   :  { %v571_v19 = vadd.f32 %v570_v58, %v2713_v36 }
 0x107   :  { %v599_v45 = vpop.f32.mrf.mxu3  ;;  %1299 = vmatmul.f32.gmra.mxu0 %v662_v26  ;;  %1383 = vmatmul.f32.gmra.mxu3 %v649_v31 }
 0x108   :  { %v943_v32 = vpop.f32.mrf.mxu0  ;;  %v600_v34 = vadd.f32 %v599_v45, %v2729_v49  ;;  %v664_v28 = vmax.f32 %v571_v19, 0.0 }
 0x109   :  { %v944_v33 = vadd.f32 %v1479_v29, %v943_v32  ;;  %1328 = vmatmul.f32.gmra.mxu1 %v663_v16 }
 0x10a   :  { %v972_v0 = vpop.f32.mrf.mxu1  ;;  %v665_v37 = vmax.f32 %v600_v34, 0.0 }
 0x10b   :  { %v973_v3 = vadd.f32 %v972_v0, %v944_v33 }
 0x10c   :  { %1357 = vmatmul.f32.gmra.mxu2 %v664_v28 }
 0x10f   :  { %1386 = vmatmul.f32.gmra.mxu3 %v665_v37 }
 0x110   :  { %v946_v38 = vpop.f32.mrf.mxu0 }
 0x111   :  { %v947_v39 = vadd.f32 %v1479_v29, %v946_v38 }
 0x112   :  { %v975_v41 = vpop.f32.mrf.mxu1 }
 0x113   :  { %v976_v44 = vadd.f32 %v975_v41, %v947_v39 }
 0x114   :  { %v1001_v36 = vpop.f32.mrf.mxu2 }
 0x115   :  { %v1002_v46 = vadd.f32 %v1001_v36, %v973_v3 }
 0x117   :  { %v1030_v47 = vpop.f32.mrf.mxu3 }
 0x118   :  { %v1031_v17 = vadd.f32 %v1030_v47, %v1002_v46  ;;  %v949_v48 = vpop.f32.mrf.mxu0 }
 0x119   :  { %v950_v50 = vadd.f32 %v1479_v29, %v949_v48 }
 0x11a   :  { %v978_v51 = vpop.f32.mrf.mxu1 }
 0x11b   :  { %v979_v53 = vadd.f32 %v978_v51, %v950_v50 }
 0x11c   :  { %v1004_v49 = vpop.f32.mrf.mxu2 }
 0x11d   :  { %v1005_v54 = vadd.f32 %v1004_v49, %v976_v44 }
 0x11f   :  { %v1033_v55 = vpop.f32.mrf.mxu3 }
 0x120   :  { %v1034_v61 = vadd.f32 %v1033_v55, %v1005_v54  ;;  %v952_v24 = vpop.f32.mrf.mxu0 }
 0x121   :  { %v953_v56 = vadd.f32 %v1479_v29, %v952_v24 }
 0x122   :  { %v981_v57 = vpop.f32.mrf.mxu1 }
 0x123   :  { %v982_v14 = vadd.f32 %v981_v57, %v953_v56 }
 0x125   :  { %v1007_v25 = vpop.f32.mrf.mxu2 }
 0x126   :  { %v1008_v59 = vadd.f32 %v1007_v25, %v979_v53 }
 0x127   :  { %v1036_v60 = vpop.f32.mrf.mxu3 }
 0x128   :  { %v1037_v30 = vadd.f32 %v1036_v60, %v1008_v59  ;;  %v1059_v62 = vpop.f32.mrf.mxu0 }
 0x129   :  { %v1060_v26 = vadd.f32 %v1059_v62, %v1031_v17 }
 0x12a   :  { %v1088_v63 = vpop.f32.mrf.mxu1 }
 0x12b   :  { %v1089_v45 = vadd.f32 %v1088_v63, %v1060_v26 }
 0x12d   :  { %v1010_v1 = vpop.f32.mrf.mxu2 }
 0x12e   :  { %v1011_v2 = vadd.f32 %v1010_v1, %v982_v14 }
 0x12f   :  { %v1039_v4 = vpop.f32.mrf.mxu3 }
 0x130   :  { %v1040_v5 = vadd.f32 %v1039_v4, %v1011_v2  ;;  %v1062_v27 = vpop.f32.mrf.mxu0 }
 0x131   :  { %v1063_v33 = vadd.f32 %v1062_v27, %v1034_v61 }
 0x132   :  { %v1091_v35 = vpop.f32.mrf.mxu1 }
 0x133   :  { %v1092_v3 = vadd.f32 %v1091_v35, %v1063_v33 }
 0x135   :  { %v1117_v43 = vpop.f32.mrf.mxu2 }
 0x136   :  { %v1118_v16 = vadd.f32 %v1117_v43, %v1089_v45 }
 0x137   :  { %v1146_v6 = vpop.f32.mrf.mxu3 }
 0x138   :  { %v1065_v7 = vpop.f32.mrf.mxu0  ;;  %v1147_v34 = vadd.f32 %v1146_v6, %v1118_v16 }
 0x139   :  { %v1066_v41 = vadd.f32 %v1065_v7, %v1037_v30 }
 0x13a   :  { %v1094_v8 = vpop.f32.mrf.mxu1 }
 0x13b   :  { %v1095_v17 = vadd.f32 %v1094_v8, %v1066_v41 }
 0x13d   :  { %v1120_v9 = vpop.f32.mrf.mxu2 }
 0x13e   :  { %v1121_v39 = vadd.f32 %v1120_v9, %v1092_v3 }
 0x13f   :  { %v1149_v10 = vpop.f32.mrf.mxu3 }
 0x140   :  { %v1068_v11 = vpop.f32.mrf.mxu0  ;;  %v1150_v46 = vadd.f32 %v1149_v10, %v1121_v39 }
 0x141   :  { %v1069_v55 = vadd.f32 %v1068_v11, %v1040_v5 }
 0x142   :  { %v1097_v42 = vpop.f32.mrf.mxu1 }
 0x143   :  { %v1098_v25 = vadd.f32 %v1097_v42, %v1069_v55 }
 0x145   :  { %v1123_v12 = vpop.f32.mrf.mxu2 }
 0x146   :  { %v1124_v53 = vadd.f32 %v1123_v12, %v1095_v17 }
 0x147   :  { %v1152_v13 = vpop.f32.mrf.mxu3 }
 0x148   :  { %v1175_v15 = vpop.f32.mrf.mxu0  ;;  %v1153_v57 = vadd.f32 %v1152_v13, %v1124_v53 }
 0x149   :  { %v1176_v37 = vadd.f32 %v1175_v15, %v1147_v34 }
 0x14a   :  { %v1204_v40 = vpop.f32.mrf.mxu1 }
 0x14b   :  { %v1205_v44 = vadd.f32 %v1204_v40, %v1176_v37 }
 0x14d   :  { %v1126_v52 = vpop.f32.mrf.mxu2 }
 0x14e   :  { %v1127_v63 = vadd.f32 %v1126_v52, %v1098_v25 }
 0x14f   :  { %v1155_v18 = vpop.f32.mrf.mxu3 }
 0x150   :  { %v1178_v20 = vpop.f32.mrf.mxu0  ;;  %v1156_v6 = vadd.f32 %v1155_v18, %v1127_v63 }
 0x151   :  { %v1179_v48 = vadd.f32 %v1178_v20, %v1150_v46 }
 0x152   :  { %v1207_v21 = vpop.f32.mrf.mxu1 }
 0x153   :  { %v1208_v61 = vadd.f32 %v1207_v21, %v1179_v48 }
 0x155   :  { %v1233_v22 = vpop.f32.mrf.mxu2 }
 0x156   :  { %v1234_v47 = vadd.f32 %v1233_v22, %v1205_v44 }
 0x157   :  { %v1262_v23 = vpop.f32.mrf.mxu3 }
 0x158   :  { %v1181_v58 = vpop.f32.mrf.mxu0  ;;  %v1263_v49 = vadd.f32 %v1262_v23, %v1234_v47 }
 0x159   :  { %v1182_v59 = vadd.f32 %v1181_v58, %v1153_v57 }
 0x15b   :  { %v1210_v29 = vpop.f32.mrf.mxu1 }
 0x15c   :  { %v1211_v4 = vadd.f32 %v1210_v29, %v1182_v59 }
 0x15d   :  { %v1236_v31 = vpop.f32.mrf.mxu2 }
 0x15e   :  { %v1237_v14 = vadd.f32 %v1236_v31, %v1208_v61 }
 0x15f   :  { %v1265_v19 = vpop.f32.mrf.mxu3 }
 0x160   :  { %v1266_v1 = vadd.f32 %v1265_v19, %v1237_v14 }
 0x161   :  { %v1184_v32 = vpop.f32.mrf.mxu0 }
 0x162   :  { %v1185_v8 = vadd.f32 %v1184_v32, %v1156_v6 }
 0x165   :  { %v1213_v0 = vpop.f32.mrf.mxu1  ;;  %v1239_v28 = vpop.f32.mrf.mxu2 }
 0x166   :  { %v1240_v7 = vadd.f32 %v1239_v28, %v1211_v4  ;;  %v1214_v13 = vadd.f32 %v1213_v0, %v1185_v8 }
 0x168   :  { %v1268_v38 = vpop.f32.mrf.mxu3 }
 0x169   :  { %v1269_v11 = vadd.f32 %v1268_v38, %v1240_v7 }
 0x16c   :  { %v1291_v36 = vpop.f32.mrf.mxu0 }
 0x16d   :  { %v1292_v24 = vadd.f32 %v1291_v36, %v1263_v49 }
 0x16e   :  { %v1320_v50 = vpop.f32.mrf.mxu1 }
 0x16f   :  { %v1242_v51 = vpop.f32.mrf.mxu2  ;;  %v1321_v60 = vadd.f32 %v1320_v50, %v1292_v24 }
 0x170   :  { %v1243_v20 = vadd.f32 %v1242_v51, %v1214_v13 }
 0x171   :  { %v1271_v54 = vpop.f32.mrf.mxu3 }
 0x172   :  { %v1272_v23 = vadd.f32 %v1271_v54, %v1243_v20 }
 0x174   :  { %v1294_v56 = vpop.f32.mrf.mxu0 }
 0x175   :  { %v1295_v27 = vadd.f32 %v1294_v56, %v1266_v1 }
 0x176   :  { %v1323_v30 = vpop.f32.mrf.mxu1 }
 0x177   :  { %v1349_v62 = vpop.f32.mrf.mxu2  ;;  %v1324_v9 = vadd.f32 %v1323_v30, %v1295_v27 }
 0x178   :  { %v1350_v2 = vadd.f32 %v1349_v62, %v1321_v60 }
 0x17a   :  { %v1378_v35 = vpop.f32.mrf.mxu3 }
 0x17b   :  { %v1379_v43 = vadd.f32 %v1378_v35, %v1350_v2 }
 0x17c   :  { %v1297_v5 = vpop.f32.mrf.mxu0 }
 0x17d   :  { %1390 = vst.msk [vmem:[#allocation2] sm:$0xff] %vm125_vm0, %v1379_v43  ;;  %v1298_v15 = vadd.f32 %v1297_v5, %v1269_v11 }
 0x17e   :  { %v1326_v12 = vpop.f32.mrf.mxu1 }
 0x17f   :  { %v1352_v10 = vpop.f32.mrf.mxu2  ;;  %v1327_v21 = vadd.f32 %v1326_v12, %v1298_v15 }
 0x180   :  { %v1353_v42 = vadd.f32 %v1352_v10, %v1324_v9 }
 0x182   :  { %v1381_v40 = vpop.f32.mrf.mxu3 }
 0x183   :  { %v1382_v52 = vadd.f32 %v1381_v40, %v1353_v42 }
 0x184   :  { %v1300_v22 = vpop.f32.mrf.mxu0 }
 0x185   :  { %1391 = vst.msk [vmem:[#allocation2 + $0x8] sm:$0xff] %vm125_vm0, %v1382_v52  ;;  %v1301_v26 = vadd.f32 %v1300_v22, %v1272_v23 }
 0x186   :  { %v1329_v31 = vpop.f32.mrf.mxu1 }
 0x187   :  { %v1355_v18 = vpop.f32.mrf.mxu2  ;;  %v1330_v45 = vadd.f32 %v1329_v31, %v1301_v26 }
 0x188   :  { %v1356_v58 = vadd.f32 %v1355_v18, %v1327_v21 }
 0x18a   :  { %v1384_v29 = vpop.f32.mrf.mxu3 }
 0x18b   :  { %v1385_v19 = vadd.f32 %v1384_v29, %v1356_v58 }
 0x18d   :  { %1392 = vst.msk [vmem:[#allocation2 + $0x10] sm:$0xff] %vm125_vm0, %v1385_v19 }
 0x18f   :  { %v1358_v16 = vpop.f32.mrf.mxu2 }
 0x190   :  { %v1359_v32 = vadd.f32 %v1358_v16, %v1330_v45 }
 0x192   :  { %v1387_v33 = vpop.f32.mrf.mxu3 }
 0x193   :  { %v1388_v34 = vadd.f32 %v1387_v33, %v1359_v32 }
 0x195   :  { %1393 = vst.msk [vmem:[#allocation2 + $0x18] sm:$0xff] %vm125_vm0, %v1388_v34 }
 0x196   :  { %1406 = dma.vmem_to_hbm [thread:$0]  %s1399_s25, 512, %s1401_s28, [#allocation3], %s1507_s29, %s1507_s29, %s1508_s30  }
 0x197   :  { %1504 = dma.done.wait [#allocation3], 512  }
 0x198   :  { %1505 = vsyncadd [#allocation3], 4294966784 }
 0x199   :  { %1411 = vsyncpa [#allocation3], 1 }

</bundles_post_ra>
